<compile_context>
chip_gen: v7x
topology: tpu7x:2x2x1
jax: 0.10.0
libtpu: 0.0.40
codegen_flags: <defaults>
</compile_context>

<pallas_src>
import functools

import jax
import jax.numpy as jnp
from jax import lax
from jax.experimental import pallas as pl
from jax.experimental.pallas import tpu as pltpu


def autopad(k, p=None):
    """Same semantics as the (YOLO-style) autopad used by ConvBlock."""
    if p is None:
        p = k // 2 if isinstance(k, int) else tuple(x // 2 for x in k)
    if isinstance(p, int):
        p = (p, p)
    return tuple(p)


def _round_up(x, m):
    return ((x + m - 1) // m) * m


# ---------------------------------------------------------------------------
# Kernel 1: conv (as KH*KW shifted-view matmuls) + bias, fused BN partial stats.
# Grid: (batch, output-row tiles). Input image block is resident per batch.
# ---------------------------------------------------------------------------
def _conv_bias_stats_kernel(x_ref, w_ref, b_ref, y_ref, stats_ref,
                            *, tile_oh, ow, sh, sw):
    """
    x_ref:     (1, H_pad, W_pad, C)   bf16  (resident across row tiles)
    w_ref:     (KH, KW, C, OC_pad)    bf16  (resident)
    b_ref:     (1, OC_pad)            f32
    y_ref:     (tile_oh*OW, OC_pad)   f32   conv + bias for this tile
    stats_ref: (1, 2, OC_pad)         f32   per-tile [sum; sum_sq]
    """
    kh, kw, c_in, oc_pad = w_ref.shape
    tile_rows = tile_oh * ow

    r = pl.program_id(1)
    row_step = tile_oh * sh
    row0 = pl.multiple_of(r * row_step, row_step)
    rows_needed = (tile_oh - 1) * sh + kh

    # Input row window for this tile of output rows (dynamic slice on an
    # outer dim -> cheap address arithmetic, no relayout).
    xwin = x_ref[0, pl.ds(row0, rows_needed), :, :]      # (rows_needed, W_pad, C)

    acc = jnp.zeros((tile_rows, oc_pad), jnp.float32)
    for i in range(kh):
        row_hi = i + (tile_oh - 1) * sh + 1
        for j in range(kw):
            col_hi = j + (ow - 1) * sw + 1
            sub = xwin[i:row_hi:sh, j:col_hi:sw, :]      # (tile_oh, ow, C) bf16
            lhs = sub.reshape(tile_rows, c_in)           # layout-preserving
            acc = acc + jnp.dot(lhs, w_ref[i, j],
                                preferred_element_type=jnp.float32)

    y = acc + b_ref[...]                                 # f32 (tile_rows, OC_pad)
    y_ref[...] = y

    psum = jnp.sum(y, axis=0, keepdims=True)
    psq = jnp.sum(y * y, axis=0, keepdims=True)
    stats_ref[0] = jnp.concatenate([psum, psq], axis=0)  # (2, OC_pad)


# ---------------------------------------------------------------------------
# Kernel 2: fused BN scale/shift + optional ReLU (in place on conv output).
# ---------------------------------------------------------------------------
def _bn_relu_kernel(y_ref, scale_ref, shift_ref, o_ref, *, activation):
    out = y_ref[...] * scale_ref[...] + shift_ref[...]
    if activation:
        out = jnp.maximum(out, 0.0)
    o_ref[...] = out


# ---------------------------------------------------------------------------
# Tiling helper
# ---------------------------------------------------------------------------
def _pick_tile_oh(oh, ow, max_rows=2048):
    for d in range(oh, 0, -1):
        if oh % d:
            continue
        rows = d * ow
        if rows <= max_rows and rows % 8 == 0:
            return d
    # TODO(synk): OW configurations where no row tile is sublane (8) aligned
    # need a masked / padded-M variant; fall back to full rows per image.
    return oh


# ---------------------------------------------------------------------------
# Wrapper
# ---------------------------------------------------------------------------
def conv_block_forward(x_nchw, w_hwio, conv_bias, gamma, beta,
                       stride, padding=None, activation=True, eps=1e-5):
    kh, kw, c_in, oc = w_hwio.shape
    sh, sw = stride
    ph, pw = autopad((kh, kw), padding)

    n, c, h, w = x_nchw.shape
    assert c == c_in

    oh = (h + 2 * ph - kh) // sh + 1
    ow = (w + 2 * pw - kw) // sw + 1
    m = n * oh * ow

    oc_pad = _round_up(oc, 128)
    vmem_limit = 48 * 1024 * 1024   # fits v7x (64 MiB) and well under v5e/v6e

    # ---- layout glue (XLA): NCHW -> padded NHWC; bf16 operands for the MXU.
    x_nhwc = jnp.transpose(x_nchw, (0, 2, 3, 1))
    x_pad = jnp.pad(x_nhwc.astype(jnp.float32),
                    ((0, 0), (ph, ph), (pw, pw), (0, 0))).astype(jnp.bfloat16)
    h_pad, w_pad = h + 2 * ph, w + 2 * pw

    w_p = jnp.pad(w_hwio.astype(jnp.float32),
                  ((0, 0), (0, 0), (0, 0), (0, oc_pad - oc))).astype(jnp.bfloat16)
    b_p = jnp.pad(conv_bias.astype(jnp.float32), (0, oc_pad - oc)).reshape(1, oc_pad)
    g_p = jnp.pad(gamma.astype(jnp.float32), (0, oc_pad - oc)).reshape(1, oc_pad)
    bt_p = jnp.pad(beta.astype(jnp.float32), (0, oc_pad - oc)).reshape(1, oc_pad)

    tile_oh = _pick_tile_oh(oh, ow)
    n_row_tiles = oh // tile_oh
    tile_rows = tile_oh * ow
    assert tile_rows % 8 == 0 or tile_rows == m, "row tile must be sublane aligned"

    # ---- Pallas pass 1: conv + bias, fused per-tile BN partial stats ----
    kernel1 = functools.partial(_conv_bias_stats_kernel,
                                tile_oh=tile_oh, ow=ow, sh=sh, sw=sw)
    conv_out, stats = pl.pallas_call(
        kernel1,
        out_shape=(
            jax.ShapeDtypeStruct((m, oc_pad), jnp.float32),
            jax.ShapeDtypeStruct((n * n_row_tiles, 2, oc_pad), jnp.float32),
        ),
        grid_spec=pltpu.PrefetchScalarGridSpec(
            num_scalar_prefetch=0,
            grid=(n, n_row_tiles),
            in_specs=[
                # Full padded image per batch element; constant block index
                # across the row-tile axis -> stays resident, loaded once.
                pl.BlockSpec((1, h_pad, w_pad, c_in), lambda b, r: (b, 0, 0, 0)),
                pl.BlockSpec((kh, kw, c_in, oc_pad), lambda b, r: (0, 0, 0, 0)),
                pl.BlockSpec((1, oc_pad), lambda b, r: (0, 0)),
            ],
            out_specs=[
                pl.BlockSpec((tile_rows, oc_pad),
                             lambda b, r: (b * n_row_tiles + r, 0)),
                pl.BlockSpec((1, 2, oc_pad),
                             lambda b, r: (b * n_row_tiles + r, 0, 0)),
            ],
        ),
        compiler_params=pltpu.CompilerParams(
            dimension_semantics=("parallel", "arbitrary"),
            vmem_limit_bytes=vmem_limit),
    )(x_pad, w_p, b_p)

    # ---- tiny O(OC) reduction + BN coefficient math in XLA ----
    totals = jnp.sum(stats, axis=0)                         # (2, oc_pad)
    inv_m = jnp.float32(1.0 / m)
    mean = totals[0:1] * inv_m
    var = jnp.maximum(totals[1:2] * inv_m - mean * mean, 0.0)   # biased, clamped
    scale = g_p * lax.rsqrt(var + jnp.float32(eps))
    shift = bt_p - mean * scale

    # ---- Pallas pass 2: normalize + affine + ReLU, aliased in place ----
    tm2 = tile_rows
    for cand in (4096, 2048, 1024, 512, 256, 128, 64, 32, 16, 8):
        if m % cand == 0:
            tm2 = cand
            break

    kernel2 = functools.partial(_bn_relu_kernel, activation=activation)
    out2d = pl.pallas_call(
        kernel2,
        out_shape=jax.ShapeDtypeStruct((m, oc_pad), jnp.float32),
        grid_spec=pltpu.PrefetchScalarGridSpec(
            num_scalar_prefetch=0,
            grid=(m // tm2,),
            in_specs=[
                pl.BlockSpec((tm2, oc_pad), lambda i: (i, 0)),
                pl.BlockSpec((1, oc_pad), lambda i: (0, 0)),
                pl.BlockSpec((1, oc_pad), lambda i: (0, 0)),
            ],
            out_specs=pl.BlockSpec((tm2, oc_pad), lambda i: (i, 0)),
        ),
        input_output_aliases={0: 0},
        compiler_params=pltpu.CompilerParams(
            dimension_semantics=("parallel",),
            vmem_limit_bytes=vmem_limit),
    )(conv_out, scale, shift)

    # Back to NCHW to match the PyTorch module's output convention.
    # (Keep NHWC and drop this transpose if the downstream consumer allows.)
    out = out2d.reshape(n, oh, ow, oc_pad)[..., :oc]
    return jnp.transpose(out, (0, 3, 1, 2))


# ---------------------------------------------------------------------------
# Pure-JAX f32 reference (for correctness check)
# ---------------------------------------------------------------------------
def reference(x_nchw, w_hwio, conv_bias, gamma, beta,
              stride, padding=None, activation=True, eps=1e-5):
    kh, kw, c_in, oc = w_hwio.shape
    ph, pw = autopad((kh, kw), padding)
    w_oihw = jnp.transpose(w_hwio, (3, 2, 0, 1))
    y = lax.conv_general_dilated(
        x_nchw.astype(jnp.float32), w_oihw.astype(jnp.float32),
        window_strides=stride, padding=[(ph, ph), (pw, pw)],
        dimension_numbers=("NCHW", "OIHW", "NCHW"),
        precision=lax.Precision.HIGHEST)
    y = y + conv_bias[None, :, None, None]
    mean = jnp.mean(y, axis=(0, 2, 3), keepdims=True)
    var = jnp.var(y, axis=(0, 2, 3), keepdims=True)      # biased, like BN train
    y = (y - mean) * lax.rsqrt(var + eps) * gamma[None, :, None, None] \
        + beta[None, :, None, None]
    if activation:
        y = jnp.maximum(y, 0.0)
    return y


if __name__ == "__main__":
    # ConvBlock(input_channels=4, output_channels=8, kernel_size=(3,3),
    #           stride=(1,1), padding=None, activation=True)
    N, C_IN, H, W = 2, 4, 16, 16
    OC, KH, KW = 8, 3, 3
    STRIDE = (1, 1)

    key = jax.random.PRNGKey(0)
    kx, kw_, kb = jax.random.split(key, 3)

    x = jax.random.normal(kx, (N, C_IN, H, W), dtype=jnp.float32)

    # Deterministic parameter init (shapes match nn.Conv2d / nn.BatchNorm2d).
    fan_in = C_IN * KH * KW
    bound = 1.0 / (fan_in ** 0.5)
    w_hwio = jax.random.uniform(kw_, (KH, KW, C_IN, OC), jnp.float32,
                                minval=-bound, maxval=bound)
    conv_bias = jax.random.uniform(kb, (OC,), jnp.float32,
                                   minval=-bound, maxval=bound)
    gamma = jnp.ones((OC,), jnp.float32)    # BatchNorm2d default weight
    beta = jnp.zeros((OC,), jnp.float32)    # BatchNorm2d default bias

    out = conv_block_forward(x, w_hwio, conv_bias, gamma, beta,
                             stride=STRIDE, padding=None, activation=True)
    out = jax.block_until_ready(out)

    ref = reference(x, w_hwio, conv_bias, gamma, beta,
                    stride=STRIDE, padding=None, activation=True)
    assert out.shape == (N, OC, H, W), out.shape
    # Tolerance loosened vs the f32-HIGHEST reference because the kernel uses
    # native bf16 MXU operands (f32 accumulation); error stays well under 2e-2.
    max_diff = float(jnp.max(jnp.abs(out - ref)))
    assert jnp.allclose(out, ref, rtol=2e-2, atol=2e-2), max_diff

    print("KERNEL_OK")
</pallas_src>

<mosaic_0001>
module attributes {stable_mosaic.version = 11 : i64} {
  func.func @_conv_bias_stats_kernel(%arg0: i32, %arg1: i32, %arg2: memref<1x18x18x4xbf16, #tpu.memory_space<vmem>>, %arg3: memref<3x3x4x128xbf16, #tpu.memory_space<vmem>>, %arg4: memref<1x128xf32, #tpu.memory_space<vmem>>, %arg5: memref<256x128xf32, #tpu.memory_space<vmem>>, %arg6: memref<1x2x128xf32, #tpu.memory_space<vmem>>) attributes {dimension_semantics = [#tpu.dimension_semantics<parallel>, #tpu.dimension_semantics<arbitrary>], iteration_bounds = array<i64: 2, 1>, scalar_prefetch = 0 : i64, scratch_operands = 0 : i64, tpu.core_type = #tpu.core_type<tc>, window_params = [{transform_indices = @transform_0, window_bounds = array<i64: 1, 18, 18, 4>}, {pipeline_mode = #tpu.pipeline_mode<synchronous>, transform_indices = @transform_1, window_bounds = array<i64: 3, 3, 4, 128>}, {pipeline_mode = #tpu.pipeline_mode<synchronous>, transform_indices = @transform_2, window_bounds = array<i64: 1, 128>}, {transform_indices = @transform_3, window_bounds = array<i64: 256, 128>}, {transform_indices = @transform_4, window_bounds = array<i64: 1, 2, 128>}]} {
    %c16_i32 = arith.constant 16 : i32
    %0 = arith.muli %arg1, %c16_i32 : i32
    %1 = tpu.assume_multiple %0, 16 : i32
    %c0 = arith.constant 0 : index
    %2 = arith.index_cast %1 : i32 to index
    %c0_0 = arith.constant 0 : index
    %c0_1 = arith.constant 0 : index
    %3 = vector.load %arg2[%c0, %2, %c0_0, %c0_1] : memref<1x18x18x4xbf16, #tpu.memory_space<vmem>>, vector<1x18x18x4xbf16>
    %4 = vector.shape_cast %3 : vector<1x18x18x4xbf16> to vector<18x18x4xbf16>
    %cst = arith.constant 0.000000e+00 : f32
    %5 = vector.broadcast %cst : f32 to vector<256x128xf32>
    %6 = vector.extract_strided_slice %4 {offsets = [0, 0, 0], sizes = [16, 16, 4], strides = [1, 1, 1]} : vector<18x18x4xbf16> to vector<16x16x4xbf16>
    %7 = vector.shape_cast %6 : vector<16x16x4xbf16> to vector<256x4xbf16>
    %c0_2 = arith.constant 0 : index
    %c0_3 = arith.constant 0 : index
    %c0_4 = arith.constant 0 : index
    %c0_5 = arith.constant 0 : index
    %8 = vector.load %arg3[%c0_2, %c0_3, %c0_4, %c0_5] : memref<3x3x4x128xbf16, #tpu.memory_space<vmem>>, vector<1x1x4x128xbf16>
    %9 = vector.shape_cast %8 : vector<1x1x4x128xbf16> to vector<4x128xbf16>
    %cst_6 = arith.constant dense<0.000000e+00> : vector<256x128xf32>
    %10 = tpu.matmul %7, %9, %cst_6 {dimension_numbers = #tpu.dot_dimension_numbers<[1], [0], [0], [1], [0, 0, 1, 1], [], []>} : vector<256x4xbf16>, vector<4x128xbf16>, vector<256x128xf32> -> vector<256x128xf32>
    %11 = arith.addf %5, %10 : vector<256x128xf32>
    %12 = vector.extract_strided_slice %4 {offsets = [0, 1, 0], sizes = [16, 16, 4], strides = [1, 1, 1]} : vector<18x18x4xbf16> to vector<16x16x4xbf16>
    %13 = vector.shape_cast %12 : vector<16x16x4xbf16> to vector<256x4xbf16>
    %c0_7 = arith.constant 0 : index
    %c1 = arith.constant 1 : index
    %c0_8 = arith.constant 0 : index
    %c0_9 = arith.constant 0 : index
    %14 = vector.load %arg3[%c0_7, %c1, %c0_8, %c0_9] : memref<3x3x4x128xbf16, #tpu.memory_space<vmem>>, vector<1x1x4x128xbf16>
    %15 = vector.shape_cast %14 : vector<1x1x4x128xbf16> to vector<4x128xbf16>
    %cst_10 = arith.constant dense<0.000000e+00> : vector<256x128xf32>
    %16 = tpu.matmul %13, %15, %cst_10 {dimension_numbers = #tpu.dot_dimension_numbers<[1], [0], [0], [1], [0, 0, 1, 1], [], []>} : vector<256x4xbf16>, vector<4x128xbf16>, vector<256x128xf32> -> vector<256x128xf32>
    %17 = arith.addf %11, %16 : vector<256x128xf32>
    %18 = vector.extract_strided_slice %4 {offsets = [0, 2, 0], sizes = [16, 16, 4], strides = [1, 1, 1]} : vector<18x18x4xbf16> to vector<16x16x4xbf16>
    %19 = vector.shape_cast %18 : vector<16x16x4xbf16> to vector<256x4xbf16>
    %c0_11 = arith.constant 0 : index
    %c2 = arith.constant 2 : index
    %c0_12 = arith.constant 0 : index
    %c0_13 = arith.constant 0 : index
    %20 = vector.load %arg3[%c0_11, %c2, %c0_12, %c0_13] : memref<3x3x4x128xbf16, #tpu.memory_space<vmem>>, vector<1x1x4x128xbf16>
    %21 = vector.shape_cast %20 : vector<1x1x4x128xbf16> to vector<4x128xbf16>
    %cst_14 = arith.constant dense<0.000000e+00> : vector<256x128xf32>
    %22 = tpu.matmul %19, %21, %cst_14 {dimension_numbers = #tpu.dot_dimension_numbers<[1], [0], [0], [1], [0, 0, 1, 1], [], []>} : vector<256x4xbf16>, vector<4x128xbf16>, vector<256x128xf32> -> vector<256x128xf32>
    %23 = arith.addf %17, %22 : vector<256x128xf32>
    %24 = vector.extract_strided_slice %4 {offsets = [1, 0, 0], sizes = [16, 16, 4], strides = [1, 1, 1]} : vector<18x18x4xbf16> to vector<16x16x4xbf16>
    %25 = vector.shape_cast %24 : vector<16x16x4xbf16> to vector<256x4xbf16>
    %c1_15 = arith.constant 1 : index
    %c0_16 = arith.constant 0 : index
    %c0_17 = arith.constant 0 : index
    %c0_18 = arith.constant 0 : index
    %26 = vector.load %arg3[%c1_15, %c0_16, %c0_17, %c0_18] : memref<3x3x4x128xbf16, #tpu.memory_space<vmem>>, vector<1x1x4x128xbf16>
    %27 = vector.shape_cast %26 : vector<1x1x4x128xbf16> to vector<4x128xbf16>
    %cst_19 = arith.constant dense<0.000000e+00> : vector<256x128xf32>
    %28 = tpu.matmul %25, %27, %cst_19 {dimension_numbers = #tpu.dot_dimension_numbers<[1], [0], [0], [1], [0, 0, 1, 1], [], []>} : vector<256x4xbf16>, vector<4x128xbf16>, vector<256x128xf32> -> vector<256x128xf32>
    %29 = arith.addf %23, %28 : vector<256x128xf32>
    %30 = vector.extract_strided_slice %4 {offsets = [1, 1, 0], sizes = [16, 16, 4], strides = [1, 1, 1]} : vector<18x18x4xbf16> to vector<16x16x4xbf16>
    %31 = vector.shape_cast %30 : vector<16x16x4xbf16> to vector<256x4xbf16>
    %c1_20 = arith.constant 1 : index
    %c1_21 = arith.constant 1 : index
    %c0_22 = arith.constant 0 : index
    %c0_23 = arith.constant 0 : index
    %32 = vector.load %arg3[%c1_20, %c1_21, %c0_22, %c0_23] : memref<3x3x4x128xbf16, #tpu.memory_space<vmem>>, vector<1x1x4x128xbf16>
    %33 = vector.shape_cast %32 : vector<1x1x4x128xbf16> to vector<4x128xbf16>
    %cst_24 = arith.constant dense<0.000000e+00> : vector<256x128xf32>
    %34 = tpu.matmul %31, %33, %cst_24 {dimension_numbers = #tpu.dot_dimension_numbers<[1], [0], [0], [1], [0, 0, 1, 1], [], []>} : vector<256x4xbf16>, vector<4x128xbf16>, vector<256x128xf32> -> vector<256x128xf32>
    %35 = arith.addf %29, %34 : vector<256x128xf32>
    %36 = vector.extract_strided_slice %4 {offsets = [1, 2, 0], sizes = [16, 16, 4], strides = [1, 1, 1]} : vector<18x18x4xbf16> to vector<16x16x4xbf16>
    %37 = vector.shape_cast %36 : vector<16x16x4xbf16> to vector<256x4xbf16>
    %c1_25 = arith.constant 1 : index
    %c2_26 = arith.constant 2 : index
    %c0_27 = arith.constant 0 : index
    %c0_28 = arith.constant 0 : index
    %38 = vector.load %arg3[%c1_25, %c2_26, %c0_27, %c0_28] : memref<3x3x4x128xbf16, #tpu.memory_space<vmem>>, vector<1x1x4x128xbf16>
    %39 = vector.shape_cast %38 : vector<1x1x4x128xbf16> to vector<4x128xbf16>
    %cst_29 = arith.constant dense<0.000000e+00> : vector<256x128xf32>
    %40 = tpu.matmul %37, %39, %cst_29 {dimension_numbers = #tpu.dot_dimension_numbers<[1], [0], [0], [1], [0, 0, 1, 1], [], []>} : vector<256x4xbf16>, vector<4x128xbf16>, vector<256x128xf32> -> vector<256x128xf32>
    %41 = arith.addf %35, %40 : vector<256x128xf32>
    %42 = vector.extract_strided_slice %4 {offsets = [2, 0, 0], sizes = [16, 16, 4], strides = [1, 1, 1]} : vector<18x18x4xbf16> to vector<16x16x4xbf16>
    %43 = vector.shape_cast %42 : vector<16x16x4xbf16> to vector<256x4xbf16>
    %c2_30 = arith.constant 2 : index
    %c0_31 = arith.constant 0 : index
    %c0_32 = arith.constant 0 : index
    %c0_33 = arith.constant 0 : index
    %44 = vector.load %arg3[%c2_30, %c0_31, %c0_32, %c0_33] : memref<3x3x4x128xbf16, #tpu.memory_space<vmem>>, vector<1x1x4x128xbf16>
    %45 = vector.shape_cast %44 : vector<1x1x4x128xbf16> to vector<4x128xbf16>
    %cst_34 = arith.constant dense<0.000000e+00> : vector<256x128xf32>
    %46 = tpu.matmul %43, %45, %cst_34 {dimension_numbers = #tpu.dot_dimension_numbers<[1], [0], [0], [1], [0, 0, 1, 1], [], []>} : vector<256x4xbf16>, vector<4x128xbf16>, vector<256x128xf32> -> vector<256x128xf32>
    %47 = arith.addf %41, %46 : vector<256x128xf32>
    %48 = vector.extract_strided_slice %4 {offsets = [2, 1, 0], sizes = [16, 16, 4], strides = [1, 1, 1]} : vector<18x18x4xbf16> to vector<16x16x4xbf16>
    %49 = vector.shape_cast %48 : vector<16x16x4xbf16> to vector<256x4xbf16>
    %c2_35 = arith.constant 2 : index
    %c1_36 = arith.constant 1 : index
    %c0_37 = arith.constant 0 : index
    %c0_38 = arith.constant 0 : index
    %50 = vector.load %arg3[%c2_35, %c1_36, %c0_37, %c0_38] : memref<3x3x4x128xbf16, #tpu.memory_space<vmem>>, vector<1x1x4x128xbf16>
    %51 = vector.shape_cast %50 : vector<1x1x4x128xbf16> to vector<4x128xbf16>
    %cst_39 = arith.constant dense<0.000000e+00> : vector<256x128xf32>
    %52 = tpu.matmul %49, %51, %cst_39 {dimension_numbers = #tpu.dot_dimension_numbers<[1], [0], [0], [1], [0, 0, 1, 1], [], []>} : vector<256x4xbf16>, vector<4x128xbf16>, vector<256x128xf32> -> vector<256x128xf32>
    %53 = arith.addf %47, %52 : vector<256x128xf32>
    %54 = vector.extract_strided_slice %4 {offsets = [2, 2, 0], sizes = [16, 16, 4], strides = [1, 1, 1]} : vector<18x18x4xbf16> to vector<16x16x4xbf16>
    %55 = vector.shape_cast %54 : vector<16x16x4xbf16> to vector<256x4xbf16>
    %c2_40 = arith.constant 2 : index
    %c2_41 = arith.constant 2 : index
    %c0_42 = arith.constant 0 : index
    %c0_43 = arith.constant 0 : index
    %56 = vector.load %arg3[%c2_40, %c2_41, %c0_42, %c0_43] : memref<3x3x4x128xbf16, #tpu.memory_space<vmem>>, vector<1x1x4x128xbf16>
    %57 = vector.shape_cast %56 : vector<1x1x4x128xbf16> to vector<4x128xbf16>
    %cst_44 = arith.constant dense<0.000000e+00> : vector<256x128xf32>
    %58 = tpu.matmul %55, %57, %cst_44 {dimension_numbers = #tpu.dot_dimension_numbers<[1], [0], [0], [1], [0, 0, 1, 1], [], []>} : vector<256x4xbf16>, vector<4x128xbf16>, vector<256x128xf32> -> vector<256x128xf32>
    %59 = arith.addf %53, %58 : vector<256x128xf32>
    %c0_45 = arith.constant 0 : index
    %c0_46 = arith.constant 0 : index
    %60 = vector.load %arg4[%c0_45, %c0_46] : memref<1x128xf32, #tpu.memory_space<vmem>>, vector<1x128xf32>
    %61 = vector.broadcast %60 : vector<1x128xf32> to vector<256x128xf32>
    %62 = arith.addf %59, %61 : vector<256x128xf32>
    %c0_47 = arith.constant 0 : index
    %c0_48 = arith.constant 0 : index
    %63 = vector.load %arg5[%c0_47, %c0_48] : memref<256x128xf32, #tpu.memory_space<vmem>>, vector<256x128xf32>
    tpu.vector_store %arg5[%c0_47, %c0_48], %62 {strides = array<i32>} : memref<256x128xf32, #tpu.memory_space<vmem>>, vector<256x128xf32>,
    %cst_49 = arith.constant dense<0.000000e+00> : vector<128xf32>
    %64 = vector.multi_reduction <add>, %62, %cst_49 [0] : vector<256x128xf32> to vector<128xf32>
    %65 = vector.shape_cast %64 : vector<128xf32> to vector<1x128xf32>
    %66 = arith.mulf %62, %62 : vector<256x128xf32>
    %cst_50 = arith.constant dense<0.000000e+00> : vector<128xf32>
    %67 = vector.multi_reduction <add>, %66, %cst_50 [0] : vector<256x128xf32> to vector<128xf32>
    %68 = vector.shape_cast %67 : vector<128xf32> to vector<1x128xf32>
    %69 = tpu.concatenate %65, %68 in 0 : vector<1x128xf32>, vector<1x128xf32> -> vector<2x128xf32>
    %c0_51 = arith.constant 0 : index
    %c0_52 = arith.constant 0 : index
    %c0_53 = arith.constant 0 : index
    %70 = vector.load %arg6[%c0_51, %c0_52, %c0_53] : memref<1x2x128xf32, #tpu.memory_space<vmem>>, vector<1x2x128xf32>
    %71 = vector.shape_cast %70 : vector<1x2x128xf32> to vector<2x128xf32>
    %72 = vector.shape_cast %69 : vector<2x128xf32> to vector<1x2x128xf32>
    tpu.vector_store %arg6[%c0_51, %c0_52, %c0_53], %72 {strides = array<i32>} : memref<1x2x128xf32, #tpu.memory_space<vmem>>, vector<1x2x128xf32>,
    return
  }
  func.func @transform_0(%arg0: i32, %arg1: i32) -> (i32, i32, i32, i32) {
    %c0_i32 = arith.constant 0 : i32
    %c0_i32_0 = arith.constant 0 : i32
    %c0_i32_1 = arith.constant 0 : i32
    %c0_i32_2 = arith.constant 0 : i32
    return %arg0, %c0_i32, %c0_i32_0, %c0_i32_1 : i32, i32, i32, i32
  }
  func.func @transform_1(%arg0: i32, %arg1: i32) -> (i32, i32, i32, i32) {
    %c0_i32 = arith.constant 0 : i32
    %c0_i32_0 = arith.constant 0 : i32
    %c0_i32_1 = arith.constant 0 : i32
    %c0_i32_2 = arith.constant 0 : i32
    %c0_i32_3 = arith.constant 0 : i32
    return %c0_i32, %c0_i32_0, %c0_i32_1, %c0_i32_2 : i32, i32, i32, i32
  }
  func.func @transform_2(%arg0: i32, %arg1: i32) -> (i32, i32) {
    %c0_i32 = arith.constant 0 : i32
    %c0_i32_0 = arith.constant 0 : i32
    %c0_i32_1 = arith.constant 0 : i32
    return %c0_i32, %c0_i32_0 : i32, i32
  }
  func.func @transform_3(%arg0: i32, %arg1: i32) -> (i32, i32) {
    %c1_i32 = arith.constant 1 : i32
    %0 = arith.muli %arg0, %c1_i32 : i32
    %1 = arith.addi %0, %arg1 : i32
    %c0_i32 = arith.constant 0 : i32
    %c0_i32_0 = arith.constant 0 : i32
    return %1, %c0_i32 : i32, i32
  }
  func.func @transform_4(%arg0: i32, %arg1: i32) -> (i32, i32, i32) {
    %c1_i32 = arith.constant 1 : i32
    %0 = arith.muli %arg0, %c1_i32 : i32
    %1 = arith.addi %0, %arg1 : i32
    %c0_i32 = arith.constant 0 : i32
    %c0_i32_0 = arith.constant 0 : i32
    %c0_i32_1 = arith.constant 0 : i32
    return %1, %c0_i32, %c0_i32_0 : i32, i32, i32
  }
}

</mosaic_0001>

<bundles_post_ra>
// kernel: tpu_custom_call.1
= control target key start
LH: loop header
LB: loop body
LE: loop exit
PB: predicated region body
PF: predicated region fallthrough
CT: control target
= control target key end

     0   :  { %10 = vsyncpa [#allocation3], 0  ;;  %s5651_s0 = inlined_call_operand.vmem [shape: bf16[2,18,18,4], index: 0, kind: input, shape index: {}]   ;;  %s5652_s1 = inlined_call_operand.vmem [shape: bf16[3,3,4,128], index: 1, kind: input, shape index: {}]   ;;  %s5653_s2 = inlined_call_operand.vmem [shape: f32[1,128], index: 2, kind: input, shape index: {}]   ;;  %s5654_s3 = inlined_call_operand.hbm [shape: f32[512,128], index: 3, kind: output, shape index: {0}]   ;;  %s5655_s4 = inlined_call_operand.hbm [shape: f32[2,2,128], index: 4, kind: output, shape index: {1}]  }
   0x1   :  { %12 = vsyncpa [#allocation3 + $0x1], 0 }
   0x2   :  { %13 = vsyncpa [#allocation5], 0 }
   0x3   :  { %15 = vsyncpa [#allocation5 + $0x1], 0  ;;  %s4460_s15 = smov 0   ;;  %s4462_s16 = smov 0  }
   0x4   :  { %s4464_s17 = smov 0   ;;  %s4466_s18 = smov 0  }
   0x5   :  { %s4468_s19 = smov 0   ;;  %s4470_s20 = smov 0  }
   0x6 LB: > { %s3266_s21 = sadd.s32 4294967295, %s4429_s20   ;;  %s3267_s22 = sadd.s32 4294967294, %s4429_s20   ;;  %s4429_s20 = sphi %s4470_s20, %s21_s20   ;;  %s4425_s19 = sphi %s4468_s19, %s5739_s19   ;;  %s4421_s18 = sphi %s4466_s18, %s5738_s18   ;;  %s4417_s17 = sphi %s4464_s17, %s5737_s17   ;;  %s4413_s16 = sphi %s4462_s16, %s5736_s16   ;;  %s4409_s15 = sphi %s4460_s15, %s5735_s15  }
   0x7   : > { %s33_s23 = sadd.s32 1, %s4425_s19  ;;  %s110_s24 = sadd.s32 1, %s4417_s17 }
   0x8   : > { %p35_p0 = scmp.ge.s32.totalorder %s33_s23, 2  ;;  %p120_p1 = scmp.ne.s32.totalorder %s4417_s17, %s4413_s16 }
   0x9   : > { %p121_p2 = scmp.eq.s32.totalorder %s3266_s21, 1  ;;  %p126_p3 = scmp.ne.s32.totalorder %s4413_s16, %s4409_s15 }
   0xa   : > { %s5741_s23 = smov (%p35_p0, %s33_s23), 0  ;;  %p127_p5 = scmp.eq.s32.totalorder %s3267_s22, 1 }
   0xb   : > { %p4500_p4 = por %p121_p2, %p120_p1  ;;  %s107_s26 = ssub.s32 %s4425_s19, %s5741_s23 }
   0xc   : > { %p3270_p6 = scmp.ge.s32.totalorder %s4429_s20, 1  ;;  %p108_p7 = scmp.eq.s32.totalorder %s107_s26, 0 }
   0xd   : > { %p4507_p8 = por %p127_p5, %p126_p3  ;;  %p187_p9 = scmp.lt.s32.totalorder %s4429_s20, 3 }
   0xe   : > { %s4513_s28 = scalar_select %p108_p7, %s4417_s17, %s110_s24  }
   0xf   : > { %p188_p10 = pnand %p3270_p6, %p187_p9 }
  0x11   : > { %191 = sbr.rel (%p188_p10) target bundleno = 608 (0x260), region = 32 }
  0x18   : > { %v3274_v0 = vld [vmem:[%s5652_s1 + $0x2] sm:$0x3]  ;;  %vm772_vm0 = vcmask 1041408   ;;  %v3406_v1 = vld [vmem:[%s5652_s1 + $0x8] sm:$0x3]  ;;  %p218_p11 = scmp.lt.s32.totalorder %s4421_s18, 1 }
  0x19   : > { %4224 = vmatprep.subr.msk.bf16.mxu1 %vm772_vm0, %v3274_v0  ;;  %4228 = vmatprep.subr.msk.bf16.mxu0 %vm772_vm0, %v3406_v1  ;;  %v774_v2 = vsel %vm772_vm0, %v3274_v0, 0  ;;  %v4526_v3 = vsel %vm772_vm0, %v3406_v1, 0  ;;  %v285_v4 = vld [vmem:[%s5652_s1] sm:$0x3]  ;;  %v3425_v5 = vld [vmem:[%s5652_s1 + $0xa] sm:$0x3] }
  0x1a   : > { %5689 = vst [vmem:[#allocation8_spill] sm:$0xff] %v4526_v3  ;;  %3661 = vmatpush3.bf16.msra.mxu1 %v774_v2  ;;  %3797 = vmatpush3.bf16.msra.mxu0 %v4526_v3  ;;  %s219_s7 = scalar_select %p218_p11, %s4421_s18, 1  ;;  %vm286_vm1 = vsmask.f32 3328  ;;  %vm287_vm2 = vsmask.f32 7440 }
  0x1b   : > { %4225 = vmatprep.subr.msk.bf16.mxu1 %vm772_vm0, %v285_v4  ;;  %4230 = vmatprep.subr.msk.bf16.mxu0 %vm772_vm0, %v3425_v5  ;;  %v4544_v6 = vsel %vm772_vm0, %v285_v4, 0  ;;  %v4547_v7 = vsel %vm772_vm0, %v3425_v5, 0  ;;  %v4552_v8 = vld [vmem:[%s5652_s1 + $0xc] sm:$0x3]  ;;  %vm723_vm3 = vcmask 31744   ;;  %vm4588_vm4 = vmor %vm286_vm1, %vm287_vm2  ;;  %vm1245_vm5 = vcmask 1042432  }
  0x1c   : > { %s4234_s12 = smul.u32 216, %s219_s7  ;;  %v4576_v20 = vsel %vm772_vm0, %v4552_v8, 0  ;;  %vm1246_vm6 = vcmask 1046532   ;;  %s3506_s24 = sshll.u32 %s4421_s18, 12 }
  0x1d   : > { %vm4769_vm7 = vmor %vm1245_vm5, %vm1246_vm6  ;;  %s5566_s5 = scalar_lea.hbm %s5654_s3, %s3506_s24  ;;  %s4431_s8 = smov [#allocation2]  }
  0x1e   : > { %s4541_s21 = scalar_lea.vmem %s5651_s0, %s4234_s12  ;;  %s5484_s12 = sand.u32 1, %s4413_s16  }
  0x1f   : > { %v4555_v9 = vld [vmem:[%s4541_s21] sm:$0xf]  ;;  %v4558_v10 = vld [vmem:[%s4541_s21 + $0x4] sm:$0xf]  ;;  %v233_v11 = vld [vmem:[%s4541_s21 + $0x8] sm:$0x1] }
  0x20   : > { %v290_v12 = vshrl.u32 %v4555_v9, 16  ;;  %v293_v13 = vshll.u32 %v4555_v9, 16  ;;  %v299_v14 = vshll.u32 %v4558_v10, 16  ;;  %v303_v15 = vshrl.u32 %v4558_v10, 16  ;;  %v4566_v16 = vld [vmem:[%s4541_s21 + $0xc] sm:$0xf] }
  0x21   : > { %v309_v17 = vshll.u32 %v233_v11, 16  ;;  %v4569_v18 = vld [vmem:[%s4541_s21 + $0x10] sm:$0xf]  ;;  %v4572_v19 = vld [vmem:[%s4541_s21 + $0x14] sm:$0x1]  ;;  %v314_v26 = vshrl.u32 %v4566_v16, 16 }
  0x22   : > { %v292_v21 = vrot.slane %v290_v12, 4  ;;  %v295_v22 = vrot.slane %v293_v13, 5  ;;  %v301_v23 = vrot.slane %v299_v14, 5  ;;  %v305_v24 = vrot.slane %v303_v15, 4  ;;  %v4584_v33 = vld [vmem:[%s4541_s21 + $0x18] sm:$0xf] }
  0x23   : > { %v311_v25 = vrot.slane %v309_v17, 5  ;;  %v317_v27 = vshll.u32 %v4566_v16, 16  ;;  %v323_v28 = vshll.u32 %v4569_v18, 16  ;;  %v327_v31 = vshrl.u32 %v4569_v18, 16  ;;  %v4597_v39 = vld [vmem:[%s4541_s21 + $0x1c] sm:$0xf] }
  0x24   : > { %v296_v29 = vor.u32 %v295_v22, %v292_v21  ;;  %v306_v30 = vor.u32 %v305_v24, %v301_v23  ;;  %v333_v32 = vshll.u32 %v4572_v19, 16  ;;  %v316_v35 = vrot.slane %v314_v26, 4  ;;  %v4601_v46 = vld [vmem:[%s4541_s21 + $0x20] sm:$0x1]  ;;  %v4611_v57 = vld [vmem:[%s4541_s21 + $0x24] sm:$0xf] }
  0x25   : > { %v319_v36 = vrot.slane %v317_v27, 5  ;;  %v325_v37 = vrot.slane %v323_v28, 5  ;;  %v4594_v38 = vcombine.low %v4566_v16, %v4569_v18  ;;  %v329_v42 = vrot.slane %v327_v31, 4  ;;  %v4616_v62 = vld [vmem:[%s4541_s21 + $0x28] sm:$0xf]  ;;  %s3271_s13 = sshll.u32 %s5484_s12, 8 }
  0x26   : > { %v297_v40 = vrot.slane %v296_v29, 4  ;;  %v307_v41 = vrot.slane %v306_v30, 4  ;;  %v335_v43 = vrot.slane %v333_v32, 5  ;;  %v1260_v45 = vrot.slane %v4572_v19, 5  ;;  %v4624_v4 = vld [vmem:[%s4541_s21 + $0x2c] sm:$0x1] }
  0x27   : > { %v320_v44 = vor.u32 %v319_v36, %v316_v35  ;;  %v338_v47 = vshrl.u32 %v4584_v33, 16  ;;  %v341_v48 = vshll.u32 %v4584_v33, 16  ;;  %v330_v51 = vor.u32 %v329_v42, %v325_v37  ;;  %v4630_v14 = vld [vmem:[%s4541_s21 + $0x30] sm:$0xf]  ;;  %v4642_v28 = vld [vmem:[%s4541_s21 + $0x34] sm:$0xf] }
  0x28   : > { %v302_v49 = vsel %vm4588_vm4, %v297_v40, %v301_v23  ;;  %v312_v50 = vsel %vm4588_vm4, %v307_v41, %v311_v25  ;;  %v347_v52 = vshll.u32 %v4597_v39, 16  ;;  %v351_v60 = vshrl.u32 %v4597_v39, 16  ;;  %v4637_v23 = vld [vmem:[%s5652_s1 + $0x4] sm:$0x3]  ;;  %v4649_v32 = vld [vmem:[%s4541_s21 + $0x38] sm:$0x1] }
  0x29   : > { %v3275_v53 = vcombine.low %v302_v49, %v312_v50  ;;  %v321_v54 = vrot.slane %v320_v44, 4  ;;  %v340_v55 = vrot.slane %v338_v47, 4  ;;  %v343_v56 = vrot.slane %v341_v48, 5  ;;  %v4657_v48 = vld [vmem:[%s4541_s21 + $0x3c] sm:$0xf]  ;;  %s5494_s22 = scalar_lea.vmem [#allocation2], %s3271_s13 }
  0x2a   : > { %v331_v58 = vrot.slane %v330_v51, 4  ;;  %v349_v59 = vrot.slane %v347_v52, 5  ;;  %v357_v61 = vshll.u32 %v4601_v46, 16  ;;  %v1264_v1 = vrot.slane %v4597_v39, 5  ;;  %v4665_v52 = vld [vmem:[%s4541_s21 + $0x40] sm:$0xf] }
  0x2b   : > { %3662 = vmatprep.mubr.msk.bf16.mxu1 %vm723_vm3, %v3275_v53  ;;  %v326_v63 = vsel %vm4588_vm4, %v321_v54, %v325_v37  ;;  %v344_v0 = vor.u32 %v343_v56, %v340_v55  ;;  %v1267_v2 = vrot.slane %v4601_v46, 5  ;;  %v353_v11 = vrot.slane %v351_v60, 4  ;;  %s3146_s26 = sshll.u32 %s5494_s22, 4  ;;  %s3127_s6 = scalar_lea.sflag [#allocation3], %s5484_s12  ;;  %s5568_s26 = int_to_ptr.vmem [resolvable:$true] %s3146_s26 }
  0x2c   : > { %v336_v5 = vsel %vm4588_vm4, %v331_v58, %v335_v43  ;;  %v359_v12 = vrot.slane %v357_v61, 5  ;;  %v362_v13 = vshrl.u32 %v4611_v57, 16  ;;  %v365_v21 = vshll.u32 %v4611_v57, 16  ;;  %s4319_s7 = scalar_lea.vmem %s5568_s26, 4096  ;;  %s4323_s9 = sshll.u32 %s4431_s8, 4  ;;  %s4324_s9 = int_to_ptr.vmem [resolvable:$false] %s4323_s9 }
  0x2d   : > { %v3276_v15 = vcombine.low %v326_v63, %v336_v5  ;;  %v345_v17 = vrot.slane %v344_v0, 4  ;;  %v371_v22 = vshll.u32 %v4616_v62, 16  ;;  %v354_v24 = vor.u32 %v353_v11, %v349_v59  ;;  %v4677_v5 = vld [vmem:[%s4541_s21 + $0x44] sm:$0x1]  ;;  %p4320_p12 = scmp.ne.s32.totalorder %s5568_s26, %s4319_s7  ;;  %s4325_s10 = scalar_lea.vmem %s4324_s9, 8192 }
  0x2e   : > { %v364_v25 = vrot.slane %v362_v13, 4  ;;  %v375_v26 = vshrl.u32 %v4616_v62, 16  ;;  %v381_v27 = vshll.u32 %v4624_v4, 16  ;;  %v367_v30 = vrot.slane %v365_v21, 5  ;;  %v4682_v13 = vld [vmem:[%s4541_s21 + $0x48] sm:$0xf]  ;;  %p4326_p1 = scmp.lt.s32.totalorder %s5568_s26, %s4324_s9  ;;  %p4327_p2 = scmp.lt.s32.totalorder %s4325_s10, %s4319_s7 }
  0x2f   : > { %3798 = vmatprep.mubr.msk.bf16.mxu0 %vm723_vm3, %v3276_v15  ;;  %3663 = vmatmul.mubr.msk.bf16.vlgmr.msra.gmra.mrb[0].mxu1 %vm723_vm3, %v3276_v15  ;;  %v350_v29 = vsel %vm4588_vm4, %v345_v17, %v349_v59  ;;  %v373_v31 = vrot.slane %v371_v22, 5  ;;  %v386_v35 = vshrl.u32 %v4630_v14, 16  ;;  %v355_v36 = vrot.slane %v354_v24, 4  ;;  %v4689_v24 = vld [vmem:[%s4541_s21 + $0x4c] sm:$0xf]  ;;  %p4321_p13 = pnand %p4320_p12, %p4500_p4 }
  0x30   : > { %3695 = vmatpush3.bf16.msra.mxu1 %v4544_v6  ;;  %v377_v37 = vrot.slane %v375_v26, 4  ;;  %v383_v40 = vrot.slane %v381_v27, 5  ;;  %v389_v41 = vshll.u32 %v4630_v14, 16  ;;  %v368_v42 = vor.u32 %v367_v30, %v364_v25  ;;  %p4328_p3 = por %p4327_p2, %p4326_p1 }
  0x31   : > { %v388_v43 = vrot.slane %v386_v35, 4  ;;  %v395_v44 = vshll.u32 %v4642_v28, 16  ;;  %v399_v47 = vshrl.u32 %v4642_v28, 16  ;;  %4226 = vmatprep.subr.msk.bf16.mxu1 %vm772_vm0, %v4637_v23  ;;  %v360_v49 = vsel %vm4588_vm4, %v355_v36, %v359_v12  ;;  %p4322_p0 = pneg %p4321_p13 }
  0x32   : > { %v378_v6 = vor.u32 %v377_v37, %v373_v31  ;;  %v391_v50 = vrot.slane %v389_v41, 5  ;;  %v405_v51 = vshll.u32 %v4649_v32, 16  ;;  %v4667_v53 = vcombine.low %v350_v29, %v360_v49 }
  0x33   : > { %v369_v54 = vrot.slane %v368_v42, 4  ;;  %v397_v55 = vrot.slane %v395_v44, 5  ;;  %v401_v56 = vrot.slane %v399_v47, 4  ;;  %v410_v61 = vshrl.u32 %v4657_v48, 16  ;;  %v4711_v42 = vld [vmem:[%s4541_s21 + $0x54] sm:$0xf]  ;;  %p4329_p5 = pnand %p4328_p3, %p4322_p0 }
  0x34   : > { %5692 = vst [vmem:[#allocation9_spill] sm:$0xff] %v4667_v53  ;;  %v379_v58 = vrot.slane %v378_v6, 4  ;;  %v392_v59 = vor.u32 %v391_v50, %v388_v43  ;;  %v407_v60 = vrot.slane %v405_v51, 5  ;;  %3799 = vmatmul.mubr.msk.bf16.vlgmr.msra.gmra.mrb[0].mxu0 %vm723_vm3, %v4667_v53  ;;  %3666 = vmatprep.mubr.msk.bf16.mxu1 %vm723_vm3, %v4667_v53  ;;  %v413_v11 = vshll.u32 %v4657_v48, 16  ;;  %5694 = vst [vmem:[#allocation11_spill] sm:$0xff] %v4711_v42 }
  0x35   : > { %v374_v63 = vsel %vm4588_vm4, %v369_v54, %v373_v31  ;;  %v402_v0 = vor.u32 %v401_v56, %v397_v55  ;;  %v419_v12 = vshll.u32 %v4665_v52, 16  ;;  %3831 = vmatpush3.bf16.msra.mxu0 %v4547_v7  ;;  %v412_v21 = vrot.slane %v410_v61, 4  ;;  %v4716_v6 = vld [vmem:[%s4541_s21 + $0x58] sm:$0xf] }
  0x36   : > { %v384_v15 = vsel %vm4588_vm4, %v379_v58, %v383_v40  ;;  %v393_v17 = vrot.slane %v392_v59, 4  ;;  %v423_v22 = vshrl.u32 %v4665_v52, 16  ;;  %v415_v27 = vrot.slane %v413_v11, 5  ;;  %4231 = vmatprep.subr.msk.bf16.mxu0 %vm772_vm0, %v4552_v8  ;;  %v4706_v8 = vld [vmem:[%s4541_s21 + $0x50] sm:$0x1] }
  0x37   : > { %v4691_v25 = vcombine.low %v374_v63, %v384_v15  ;;  %v403_v26 = vrot.slane %v402_v0, 4  ;;  %v421_v29 = vrot.slane %v419_v12, 5  ;;  %v429_v31 = vshll.u32 %v4677_v5, 16  ;;  %v4729_v11 = vld [vmem:[%s4541_s21 + $0x5c] sm:$0x1] }
  0x38   : > { %v398_v7 = vsel %vm4588_vm4, %v393_v17, %v397_v55  ;;  %v425_v30 = vrot.slane %v423_v22, 4  ;;  %v434_v35 = vshrl.u32 %v4682_v13, 16  ;;  %v416_v37 = vor.u32 %v415_v27, %v412_v21  ;;  %v4733_v15 = vld [vmem:[%s4541_s21 + $0x60] sm:$0xf]  ;;  %v4738_v27 = vld [vmem:[%s4541_s21 + $0x64] sm:$0xf] }
  0x39   : > { %5693 = vst [vmem:[#allocation10_spill] sm:$0xff] %v4691_v25  ;;  %3802 = vmatprep.mubr.msk.bf16.mxu0 %vm723_vm3, %v4691_v25  ;;  %3667 = vmatmul.mubr.msk.bf16.gmra.mrb[4].mxu1 %vm723_vm3, %v4691_v25  ;;  %v408_v36 = vsel %vm4588_vm4, %v403_v26, %v407_v60  ;;  %v437_v40 = vshll.u32 %v4682_v13, 16  ;;  %v443_v41 = vshll.u32 %v4689_v24, 16  ;;  %v431_v47 = vrot.slane %v429_v31, 5  ;;  %v4950_v25 = vld [vmem:[%s4541_s21 + $0xa8] sm:$0xf] }
  0x3a   : > { %v4713_v43 = vcombine.low %v398_v7, %v408_v36  ;;  %v426_v44 = vor.u32 %v425_v30, %v421_v29  ;;  %v436_v49 = vrot.slane %v434_v35, 4  ;;  %v417_v50 = vrot.slane %v416_v37, 4 }
  0x3b   : > { %v439_v51 = vrot.slane %v437_v40, 5  ;;  %v445_v54 = vrot.slane %v443_v41, 5  ;;  %v447_v55 = vshrl.u32 %v4689_v24, 16  ;;  %v453_v58 = vshll.u32 %v4706_v8, 16 }
  0x3c   : > { %5695 = vst [vmem:[#allocation12_spill] sm:$0xff] %v4713_v43  ;;  %3670 = vmatprep.mubr.msk.bf16.mxu1 %vm723_vm3, %v4713_v43  ;;  %v427_v56 = vrot.slane %v426_v44, 4  ;;  %v458_v59 = vshrl.u32 %v4711_v42, 16  ;;  %v461_v60 = vshll.u32 %v4711_v42, 16  ;;  %3803 = vmatmul.mubr.msk.bf16.gmra.mrb[4].mxu0 %vm723_vm3, %v4713_v43  ;;  %v422_v61 = vsel %vm4588_vm4, %v417_v50, %v421_v29 }
  0x3d   : > { %v440_v63 = vor.u32 %v439_v51, %v436_v49  ;;  %v449_v0 = vrot.slane %v447_v55, 4  ;;  %v467_v12 = vshll.u32 %v4716_v6, 16  ;;  %v455_v21 = vrot.slane %v453_v58, 5 }
  0x3e   : > { %v432_v17 = vsel %vm4588_vm4, %v427_v56, %v431_v47  ;;  %v460_v22 = vrot.slane %v458_v59, 4  ;;  %v463_v26 = vrot.slane %v461_v60, 5  ;;  %v471_v36 = vshrl.u32 %v4716_v6, 16  ;;  %v4752_v47 = vld [vmem:[%s4541_s21 + $0x68] sm:$0x1] }
  0x3f   : > { %v4740_v7 = vcombine.low %v422_v61, %v432_v17  ;;  %v441_v29 = vrot.slane %v440_v63, 4  ;;  %v450_v30 = vor.u32 %v449_v0, %v445_v54  ;;  %v469_v31 = vrot.slane %v467_v12, 5 }
  0x40   : > { %v464_v35 = vor.u32 %v463_v26, %v460_v22  ;;  %v477_v37 = vshll.u32 %v4729_v11, 16  ;;  %v482_v40 = vshrl.u32 %v4733_v15, 16  ;;  %v485_v49 = vshll.u32 %v4733_v15, 16 }
  0x41   : > { %5696 = vst [vmem:[#allocation13_spill] sm:$0xff] %v4740_v7  ;;  %3806 = vmatprep.mubr.msk.bf16.mxu0 %vm723_vm3, %v4740_v7  ;;  %3671 = vmatmul.mubr.msk.bf16.gmra.mrb[8].mxu1 %vm723_vm3, %v4740_v7  ;;  %v446_v41 = vsel %vm4588_vm4, %v441_v29, %v445_v54  ;;  %v451_v44 = vrot.slane %v450_v30, 4  ;;  %v491_v50 = vshll.u32 %v4738_v27, 16  ;;  %v473_v55 = vrot.slane %v471_v36, 4  ;;  %v4760_v54 = vld [vmem:[%s4541_s21 + $0x6c] sm:$0xf] }
  0x42   : > { %v465_v51 = vrot.slane %v464_v35, 4  ;;  %v479_v56 = vrot.slane %v477_v37, 5  ;;  %v484_v58 = vrot.slane %v482_v40, 4  ;;  %v487_v60 = vrot.slane %v485_v49, 5  ;;  %v4776_v36 = vld [vmem:[%s4541_s21 + $0x70] sm:$0xf] }
  0x43   : > { %v456_v59 = vsel %vm4588_vm4, %v451_v44, %v455_v21  ;;  %v493_v61 = vrot.slane %v491_v50, 5  ;;  %v495_v63 = vshrl.u32 %v4738_v27, 16  ;;  %v474_v17 = vor.u32 %v473_v55, %v469_v31  ;;  %v4927_v7 = vld [vmem:[%s4541_s21 + $0xa0] sm:$0xf] }
  0x44   : > { %v4762_v0 = vcombine.low %v446_v41, %v456_v59  ;;  %v470_v12 = vsel %vm4588_vm4, %v465_v51, %v469_v31  ;;  %v501_v22 = vshll.u32 %v4752_v47, 16  ;;  %v488_v21 = vor.u32 %v487_v60, %v484_v58  ;;  %v4789_v51 = vld [vmem:[%s4541_s21 + $0x74] sm:$0x1] }
  0x45   : > { %v497_v29 = vrot.slane %v495_v63, 4  ;;  %v3340_v30 = vrot.slane %v4566_v16, 9  ;;  %v1257_v35 = vrot.slane %v4569_v18, 5  ;;  %v475_v31 = vrot.slane %v474_v17, 4 }
  0x46   : > { %5697 = vst [vmem:[#allocation14_spill] sm:$0xff] %v4762_v0  ;;  %3807 = vmatmul.mubr.msk.bf16.gmra.mrb[8].mxu0 %vm723_vm3, %v4762_v0  ;;  %3674 = vmatprep.mubr.msk.bf16.mxu1 %vm723_vm3, %v4762_v0  ;;  %v503_v37 = vrot.slane %v501_v22, 5  ;;  %v506_v40 = vshrl.u32 %v4760_v54, 16  ;;  %v509_v41 = vshll.u32 %v4760_v54, 16  ;;  %v489_v44 = vrot.slane %v488_v21, 4 }
  0x47   : > { %v498_v49 = vor.u32 %v497_v29, %v493_v61  ;;  %v1258_v16 = vsel %vm4769_vm7, %v3340_v30, %v1257_v35  ;;  %v1259_v18 = vrot.slane %v1257_v35, 4  ;;  %v480_v50 = vsel %vm4588_vm4, %v475_v31, %v479_v56  ;;  %v4801_v56 = vld [vmem:[%s4541_s21 + $0x78] sm:$0xf]  ;;  %v4817_v31 = vld [vmem:[%s4541_s21 + $0x7c] sm:$0xf] }
  0x48   : > { %v508_v55 = vrot.slane %v506_v40, 4  ;;  %v511_v58 = vrot.slane %v509_v41, 5  ;;  %v515_v59 = vshll.u32 %v4776_v36, 16  ;;  %v4792_v60 = vcombine.low %v470_v12, %v480_v50 }
  0x49   : > { %v494_v63 = vsel %vm4588_vm4, %v489_v44, %v493_v61  ;;  %v499_v17 = vrot.slane %v498_v49, 4  ;;  %v1261_v22 = vsel %vm4769_vm7, %v1259_v18, %v1260_v45  ;;  %v519_v35 = vshrl.u32 %v4776_v36, 16  ;;  %v4822_v49 = vld [vmem:[%s4541_s21 + $0x80] sm:$0x1] }
  0x4a   : > { %5700 = vst [vmem:[#allocation15_spill] sm:$0xff] %v4792_v60  ;;  %v4803_v21 = vcombine.low %v1258_v16, %v1261_v22  ;;  %v512_v29 = vor.u32 %v511_v58, %v508_v55  ;;  %v517_v30 = vrot.slane %v515_v59, 5  ;;  %3810 = vmatprep.mubr.msk.bf16.mxu0 %vm723_vm3, %v4792_v60  ;;  %3675 = vmatmul.mubr.msk.bf16.gmra.mrb[12].mxu1 %vm723_vm3, %v4792_v60  ;;  %v525_v45 = vshll.u32 %v4789_v51, 16  ;;  %v4920_v60 = vld [vmem:[%s4541_s21 + $0x9c] sm:$0xf] }
  0x4b   : > { %v504_v19 = vsel %vm4588_vm4, %v499_v17, %v503_v37  ;;  %v3341_v61 = vrot.slane %v4584_v33, 9  ;;  %v1266_v12 = vrot.slane %v1264_v1, 4  ;;  %v521_v44 = vrot.slane %v519_v35, 4 }
  0x4c   : > { %5701 = vst [vmem:[#allocation16_spill] sm:$0xff] %v4803_v21  ;;  %v4819_v40 = vcombine.low %v494_v63, %v504_v19  ;;  %v513_v41 = vrot.slane %v512_v29, 4  ;;  %v530_v16 = vshrl.u32 %v4801_v56, 16  ;;  %v527_v18 = vrot.slane %v525_v45, 5  ;;  %v4848_v29 = vld [vmem:[%s4541_s21 + $0x84] sm:$0xf] }
  0x4d   : > { %v1265_v37 = vsel %vm4769_vm7, %v3341_v61, %v1264_v1  ;;  %v1268_v50 = vsel %vm4769_vm7, %v1266_v12, %v1267_v2  ;;  %v533_v55 = vshll.u32 %v4801_v56, 16  ;;  %v522_v59 = vor.u32 %v521_v44, %v517_v30 }
  0x4e   : > { %5702 = vst [vmem:[#allocation17_spill] sm:$0xff] %v4819_v40  ;;  %3811 = vmatmul.mubr.msk.bf16.gmra.mrb[12].mxu0 %vm723_vm3, %v4819_v40  ;;  %3678 = vmatprep.mubr.msk.bf16.mxu1 %vm723_vm3, %v4819_v40  ;;  %v518_v58 = vsel %vm4588_vm4, %v513_v41, %v517_v30  ;;  %v4840_v63 = vcombine.low %v1265_v37, %v1268_v50  ;;  %v532_v1 = vrot.slane %v530_v16, 4  ;;  %v539_v2 = vshll.u32 %v4817_v31, 16  ;;  %v4854_v16 = vld [vmem:[%s4541_s21 + $0x88] sm:$0xf] }
  0x4f   : > { %3832 = vmatprep.mubr.msk.bf16.mxu0 %vm723_vm3, %v4803_v21  ;;  %v535_v46 = vrot.slane %v533_v55, 5  ;;  %v543_v17 = vshrl.u32 %v4817_v31, 16  ;;  %v549_v22 = vshll.u32 %v4822_v49, 16  ;;  %v523_v35 = vrot.slane %v522_v59, 4 }
  0x50   : > { %5703 = vst [vmem:[#allocation18_spill] sm:$0xff] %v4840_v63  ;;  %v3342_v30 = vrot.slane %v4611_v57, 9  ;;  %v1271_v19 = vrot.slane %v4616_v62, 5  ;;  %v1274_v45 = vrot.slane %v4624_v4, 5  ;;  %v541_v12 = vrot.slane %v539_v2, 5 }
  0x51   : > { %v536_v61 = vor.u32 %v535_v46, %v532_v1  ;;  %v545_v41 = vrot.slane %v543_v17, 4  ;;  %v551_v44 = vrot.slane %v549_v22, 5  ;;  %v528_v37 = vsel %vm4588_vm4, %v523_v35, %v527_v18  ;;  %v4864_v1 = vld [vmem:[%s4541_s21 + $0x8c] sm:$0x1] }
  0x52   : > { %v1272_v50 = vsel %vm4769_vm7, %v3342_v30, %v1271_v19  ;;  %v1273_v55 = vrot.slane %v1271_v19, 4  ;;  %v554_v59 = vshrl.u32 %v4848_v29, 16  ;;  %v4861_v3 = vcombine.low %v518_v58, %v528_v37 }
  0x53   : > { %v537_v40 = vrot.slane %v536_v61, 4  ;;  %v546_v4 = vor.u32 %v545_v41, %v541_v12  ;;  %v557_v46 = vshll.u32 %v4848_v29, 16  ;;  %v563_v18 = vshll.u32 %v4854_v16, 16  ;;  %v4878_v61 = vld [vmem:[%s4541_s21 + $0x90] sm:$0xf] }
  0x54   : > { %5704 = vst [vmem:[#allocation19_spill] sm:$0xff] %v4861_v3  ;;  %v1275_v2 = vsel %vm4769_vm7, %v1273_v55, %v1274_v45  ;;  %v556_v17 = vrot.slane %v554_v59, 4  ;;  %v567_v22 = vshrl.u32 %v4854_v16, 16  ;;  %3679 = vmatmul.mubr.msk.bf16.gmra.mrb[16].mxu1 %vm723_vm3, %v4861_v3  ;;  %v4883_v45 = vld [vmem:[%s5652_s1 + $0xe] sm:$0x3]  ;;  %v1278_v59 = vrot.slane %v4642_v28, 5 }
  0x55   : > { %v542_v58 = vsel %vm4588_vm4, %v537_v40, %v541_v12  ;;  %v547_v35 = vrot.slane %v546_v4, 4  ;;  %v4875_v30 = vcombine.low %v1272_v50, %v1275_v2  ;;  %v559_v19 = vrot.slane %v557_v46, 5  ;;  %5706 = vst [vmem:[#allocation21_spill] sm:$0xff] %v4883_v45  ;;  %v4897_v46 = vld [vmem:[%s4541_s21 + $0x94] sm:$0xf] }
  0x56   : > { %3833 = vmatmul.mubr.msk.bf16.vlgmr.msra.gmra.mrb[0].mxu0 %vm723_vm3, %v4840_v63  ;;  %v565_v41 = vrot.slane %v563_v18, 5  ;;  %v569_v37 = vrot.slane %v567_v22, 4  ;;  %v573_v40 = vshll.u32 %v4864_v1, 16  ;;  %v3343_v12 = vrot.slane %v4630_v14, 9  ;;  %v4902_v3 = vld [vmem:[%s4541_s21 + $0x98] sm:$0x1] }
  0x57   : > { %5705 = vst [vmem:[#allocation20_spill] sm:$0xff] %v4875_v30  ;;  %3865 = vmatpush3.bf16.msra.mxu0 %v4576_v20  ;;  %v552_v50 = vsel %vm4588_vm4, %v547_v35, %v551_v44  ;;  %3836 = vmatprep.mubr.msk.bf16.mxu0 %vm723_vm3, %v4875_v30  ;;  %v560_v55 = vor.u32 %v559_v19, %v556_v17  ;;  %v1281_v4 = vrot.slane %v4649_v32, 5  ;;  %v578_v20 = vshrl.u32 %v4878_v61, 16 }
  0x58   : > { %v4899_v2 = vcombine.low %v542_v58, %v552_v50  ;;  %v570_v18 = vor.u32 %v569_v37, %v565_v41  ;;  %v575_v22 = vrot.slane %v573_v40, 5  ;;  %4232 = vmatprep.subr.msk.bf16.mxu0 %vm772_vm0, %v4883_v45  ;;  %v1279_v17 = vsel %vm4769_vm7, %v3343_v12, %v1278_v59 }
  0x59   : > { %v561_v44 = vrot.slane %v560_v55, 4  ;;  %v1280_v35 = vrot.slane %v1278_v59, 4  ;;  %v581_v32 = vshll.u32 %v4878_v61, 16  ;;  %v580_v19 = vrot.slane %v578_v20, 4 }
  0x5a   : > { %5707 = vst [vmem:[#allocation22_spill] sm:$0xff] %v4899_v2  ;;  %3682 = vmatprep.mubr.msk.bf16.mxu1 %vm723_vm3, %v4899_v2  ;;  %v571_v58 = vrot.slane %v570_v18, 4  ;;  %v587_v37 = vshll.u32 %v4897_v46, 16  ;;  %v591_v40 = vshrl.u32 %v4897_v46, 16  ;;  %v597_v59 = vshll.u32 %v4902_v3, 16 }
  0x5b   : > { %v566_v50 = vsel %vm4588_vm4, %v561_v44, %v565_v41  ;;  %v1282_v55 = vsel %vm4769_vm7, %v1280_v35, %v1281_v4  ;;  %v583_v12 = vrot.slane %v581_v32, 5  ;;  %v3344_v4 = vrot.slane %v4657_v48, 9 }
  0x5c   : > { %v576_v2 = vsel %vm4588_vm4, %v571_v58, %v575_v22  ;;  %v4924_v18 = vcombine.low %v1279_v17, %v1282_v55  ;;  %v589_v20 = vrot.slane %v587_v37, 5  ;;  %v593_v0 = vrot.slane %v591_v40, 4  ;;  %v4940_v58 = vld [vmem:[%s4541_s21 + $0xa4] sm:$0x1] }
  0x5d   : > { %v4929_v43 = vcombine.low %v566_v50, %v576_v2  ;;  %v584_v41 = vor.u32 %v583_v12, %v580_v19  ;;  %v599_v44 = vrot.slane %v597_v59, 5  ;;  %v1285_v32 = vrot.slane %v4665_v52, 5 }
  0x5e   : > { %5708 = vst [vmem:[#allocation23_spill] sm:$0xff] %v4924_v18  ;;  %3837 = vmatmul.mubr.msk.bf16.gmra.mrb[4].mxu0 %vm723_vm3, %v4924_v18  ;;  %v594_v35 = vor.u32 %v593_v0, %v589_v20  ;;  %v1288_v22 = vrot.slane %v4677_v5, 5  ;;  %v602_v17 = vshrl.u32 %v4920_v60, 16  ;;  %v605_v19 = vshll.u32 %v4920_v60, 16 }
  0x5f   : > { %5709 = vst [vmem:[#allocation24_spill] sm:$0xff] %v4929_v43  ;;  %3683 = vmatmul.mubr.msk.bf16.gmra.mrb[20].mxu1 %vm723_vm3, %v4929_v43  ;;  %v585_v2 = vrot.slane %v584_v41, 4  ;;  %v611_v37 = vshll.u32 %v4927_v7, 16  ;;  %v615_v0 = vshrl.u32 %v4927_v7, 16  ;;  %v1286_v5 = vsel %vm4769_vm7, %v3344_v4, %v1285_v32 }
  0x60   : > { %v595_v40 = vrot.slane %v594_v35, 4  ;;  %v1287_v50 = vrot.slane %v1285_v32, 4  ;;  %v604_v55 = vrot.slane %v602_v17, 4  ;;  %v607_v59 = vrot.slane %v605_v19, 5  ;;  %v4959_v32 = vld [vmem:[%s4541_s21 + $0xac] sm:$0xf] }
  0x61   : > { %v590_v12 = vsel %vm4588_vm4, %v585_v2, %v589_v20  ;;  %v613_v41 = vrot.slane %v611_v37, 5  ;;  %v617_v43 = vrot.slane %v615_v0, 4  ;;  %v621_v35 = vshll.u32 %v4940_v58, 16 }
  0x62   : > { %v600_v53 = vsel %vm4588_vm4, %v595_v40, %v599_v44  ;;  %v1289_v18 = vsel %vm4769_vm7, %v1287_v50, %v1288_v22  ;;  %v3345_v4 = vrot.slane %v4682_v13, 9  ;;  %v608_v2 = vor.u32 %v607_v59, %v604_v55 }
  0x63   : > { %v4961_v17 = vcombine.low %v590_v12, %v600_v53  ;;  %v4963_v20 = vcombine.low %v1286_v5, %v1289_v18  ;;  %v618_v19 = vor.u32 %v617_v43, %v613_v41  ;;  %v623_v37 = vrot.slane %v621_v35, 5  ;;  %v4973_v18 = vld [vmem:[%s4541_s21 + $0xb0] sm:$0x1] }
  0x64   : > { %v1292_v0 = vrot.slane %v4689_v24, 5  ;;  %v1295_v44 = vrot.slane %v4706_v8, 5  ;;  %v626_v22 = vshrl.u32 %v4950_v25, 16  ;;  %v609_v53 = vrot.slane %v608_v2, 4 }
  0x65   : > { %5710 = vst [vmem:[#allocation25_spill] sm:$0xff] %v4961_v17  ;;  %5711 = vst [vmem:[#allocation26_spill] sm:$0xff] %v4963_v20  ;;  %3686 = vmatprep.mubr.msk.bf16.mxu1 %vm723_vm3, %v4961_v17  ;;  %3840 = vmatprep.mubr.msk.bf16.mxu0 %vm723_vm3, %v4963_v20  ;;  %v619_v40 = vrot.slane %v618_v19, 4  ;;  %v629_v43 = vshll.u32 %v4950_v25, 16  ;;  %v635_v5 = vshll.u32 %v4959_v32, 16  ;;  %v639_v12 = vshrl.u32 %v4959_v32, 16 }
  0x66   : > { %v1293_v8 = vsel %vm4769_vm7, %v3345_v4, %v1292_v0  ;;  %v1294_v50 = vrot.slane %v1292_v0, 4  ;;  %v628_v55 = vrot.slane %v626_v22, 4  ;;  %v614_v59 = vsel %vm4588_vm4, %v609_v53, %v613_v41  ;;  %v4985_v17 = vld [vmem:[%s4541_s21 + $0xb4] sm:$0xf]  ;;  %v4997_v53 = vld [vmem:[%s4541_s21 + $0xb8] sm:$0xf] }
  0x67   : > { %v624_v35 = vsel %vm4588_vm4, %v619_v40, %v623_v37  ;;  %v631_v2 = vrot.slane %v629_v43, 5  ;;  %v637_v19 = vrot.slane %v635_v5, 5  ;;  %v641_v0 = vrot.slane %v639_v12, 4 }
  0x68   : > { %v4987_v20 = vcombine.low %v614_v59, %v624_v35  ;;  %v1296_v4 = vsel %vm4769_vm7, %v1294_v50, %v1295_v44  ;;  %v645_v22 = vshll.u32 %v4973_v18, 16  ;;  %v3346_v41 = vrot.slane %v4711_v42, 9  ;;  %v5003_v44 = vld [vmem:[%s4541_s21 + $0xbc] sm:$0x1] }
  0x69   : > { %v4992_v30 = vcombine.low %v1293_v8, %v1296_v4  ;;  %v632_v63 = vor.u32 %v631_v2, %v628_v55  ;;  %v1299_v37 = vrot.slane %v4716_v6, 5  ;;  %v642_v40 = vor.u32 %v641_v0, %v637_v19 }
  0x6a   : > { %5712 = vst [vmem:[#allocation27_spill] sm:$0xff] %v4987_v20  ;;  %3687 = vmatmul.mubr.msk.bf16.gmra.mrb[24].mxu1 %vm723_vm3, %v4987_v20  ;;  %v647_v43 = vrot.slane %v645_v22, 5  ;;  %v1302_v5 = vrot.slane %v4729_v11, 5  ;;  %v650_v50 = vshrl.u32 %v4985_v17, 16  ;;  %v653_v59 = vshll.u32 %v4985_v17, 16 }
  0x6b   : > { %5713 = vst [vmem:[#allocation28_spill] sm:$0xff] %v4992_v30  ;;  %3841 = vmatmul.mubr.msk.bf16.gmra.mrb[8].mxu0 %vm723_vm3, %v4992_v30  ;;  %v633_v8 = vrot.slane %v632_v63, 4  ;;  %v1300_v55 = vsel %vm4769_vm7, %v3346_v41, %v1299_v37  ;;  %v1301_v12 = vrot.slane %v1299_v37, 4  ;;  %v643_v35 = vrot.slane %v642_v40, 4 }
  0x6c   : > { %v652_v2 = vrot.slane %v650_v50, 4  ;;  %v659_v4 = vshll.u32 %v4997_v53, 16  ;;  %v663_v11 = vshrl.u32 %v4997_v53, 16  ;;  %v655_v20 = vrot.slane %v653_v59, 5 }
  0x6d   : > { %v638_v0 = vsel %vm4588_vm4, %v633_v8, %v637_v19  ;;  %v1303_v22 = vsel %vm4769_vm7, %v1301_v12, %v1302_v5  ;;  %v669_v63 = vshll.u32 %v5003_v44, 16  ;;  %v648_v41 = vsel %vm4588_vm4, %v643_v35, %v647_v43 }
  0x6e   : > { %v5020_v37 = vcombine.low %v1300_v55, %v1303_v22  ;;  %v661_v40 = vrot.slane %v659_v4, 5  ;;  %v665_v50 = vrot.slane %v663_v11, 4  ;;  %v5022_v30 = vcombine.low %v638_v0, %v648_v41 }
  0x6f   : > { %v656_v21 = vor.u32 %v655_v20, %v652_v2  ;;  %v671_v45 = vrot.slane %v669_v63, 5  ;;  %v3347_v42 = vrot.slane %v4733_v15, 9  ;;  %v1306_v5 = vrot.slane %v4738_v27, 5 }
  0x70   : > { %3844 = vmatprep.mubr.msk.bf16.mxu0 %vm723_vm3, %v5020_v37  ;;  %v666_v19 = vor.u32 %v665_v50, %v661_v40  ;;  %v1309_v8 = vrot.slane %v4752_v47, 5  ;;  %v3348_v43 = vrot.slane %v4760_v54, 9  ;;  %3690 = vmatprep.mubr.msk.bf16.mxu1 %vm723_vm3, %v5022_v30  ;;  %v3307_v20 = vcombine.low %v4555_v9, %v4558_v10 }
  0x71   : > { %v657_v55 = vrot.slane %v656_v21, 4  ;;  %v1313_v12 = vrot.slane %v4776_v36, 5  ;;  %v1316_v59 = vrot.slane %v4789_v51, 5  ;;  %v1307_v2 = vsel %vm4769_vm7, %v3347_v42, %v1306_v5 }
  0x72   : > { %v667_v35 = vrot.slane %v666_v19, 4  ;;  %v1308_v4 = vrot.slane %v1306_v5, 4  ;;  %v1320_v47 = vrot.slane %v4817_v31, 5  ;;  %v3349_v9 = vrot.slane %v4801_v56, 9 }
  0x73   : > { %v662_v11 = vsel %vm4588_vm4, %v657_v55, %v661_v40  ;;  %v1314_v21 = vsel %vm4769_vm7, %v3348_v43, %v1313_v12  ;;  %v1315_v0 = vrot.slane %v1313_v12, 4  ;;  %v1323_v42 = vrot.slane %v4822_v49, 5 }
  0x74   : > { %v672_v10 = vsel %vm4588_vm4, %v667_v35, %v671_v45  ;;  %v1310_v51 = vsel %vm4769_vm7, %v1308_v4, %v1309_v8  ;;  %v1322_v22 = vrot.slane %v1320_v47, 4  ;;  %v3350_v19 = vrot.slane %v4848_v29, 9 }
  0x75   : > { %v5049_v63 = vcombine.low %v662_v11, %v672_v10  ;;  %v5051_v41 = vcombine.low %v1307_v2, %v1310_v51  ;;  %v1317_v40 = vsel %vm4769_vm7, %v1315_v0, %v1316_v59  ;;  %v1327_v5 = vrot.slane %v4854_v16, 5 }
  0x76   : > { %v5055_v50 = vcombine.low %v1314_v21, %v1317_v40  ;;  %v1330_v49 = vrot.slane %v4864_v1, 5  ;;  %v1321_v45 = vsel %vm4769_vm7, %v3349_v9, %v1320_v47  ;;  %v1324_v8 = vsel %vm4769_vm7, %v1322_v22, %v1323_v42 }
  0x77   : > { %3691 = vmatmul.mubr.msk.bf16.gmra.mrb[28].mxu1 %vm723_vm3, %v5049_v63  ;;  %3845 = vmatmul.mubr.msk.bf16.gmra.mrb[12].mxu0 %vm723_vm3, %v5051_v41  ;;  %v1329_v43 = vrot.slane %v1327_v5, 4  ;;  %v1334_v55 = vrot.slane %v4897_v46, 5  ;;  %v1341_v12 = vrot.slane %v4927_v7, 5  ;;  %v1328_v59 = vsel %vm4769_vm7, %v3350_v19, %v1327_v5 }
  0x78   : > { %3696 = vmatprep.mubr.msk.bf16.mxu1 %vm723_vm3, %v3307_v20  ;;  %3848 = vmatprep.mubr.msk.bf16.mxu0 %vm723_vm3, %v5055_v50  ;;  %v5077_v20 = vcombine.low %v1321_v45, %v1324_v8  ;;  %v3351_v35 = vrot.slane %v4878_v61, 9  ;;  %v1337_v4 = vrot.slane %v4902_v3, 5  ;;  %v5083_v47 = vcombine.low %v4584_v33, %v4597_v39  ;;  %v5095_v3 = vld [vmem:[%s5652_s1 + $0x6] sm:$0x3] }
  0x79   : > { %v1331_v1 = vsel %vm4769_vm7, %v1329_v43, %v1330_v49  ;;  %v1336_v2 = vrot.slane %v1334_v55, 4  ;;  %v3352_v11 = vrot.slane %v4920_v60, 9  ;;  %v1459_v21 = vsel %vm772_vm0, %v4637_v23, 0 }
  0x7a   : > { %v5088_v0 = vcombine.low %v1328_v59, %v1331_v1  ;;  %v1343_v9 = vrot.slane %v1341_v12, 4  ;;  %v1344_v10 = vrot.slane %v4940_v58, 5  ;;  %v1348_v51 = vrot.slane %v4959_v32, 5 }
  0x7b   : > { %v1335_v33 = vsel %vm4769_vm7, %v3351_v35, %v1334_v55  ;;  %v1338_v39 = vsel %vm4769_vm7, %v1336_v2, %v1337_v4  ;;  %v5109_v23 = vcombine.low %v4611_v57, %v4616_v62  ;;  %v1342_v58 = vsel %vm4769_vm7, %v3352_v11, %v1341_v12 }
  0x7c   : > { %v5115_v22 = vcombine.low %v4733_v15, %v4738_v27  ;;  %v1345_v42 = vsel %vm4769_vm7, %v1343_v9, %v1344_v10  ;;  %v3353_v40 = vrot.slane %v4950_v25, 9  ;;  %v1355_v19 = vrot.slane %v4997_v53, 5 }
  0x7d   : > { %v5125_v57 = vcombine.low %v4760_v54, %v4776_v36  ;;  %v5129_v62 = vcombine.low %v1335_v33, %v1338_v39  ;;  %v1350_v15 = vrot.slane %v1348_v51, 4  ;;  %v1351_v27 = vrot.slane %v4973_v18, 5  ;;  %v281_v18 = vld [vmem:[%s4541_s21 + $0xc8] sm:$0x1] }
  0x7e   : > { %v5134_v5 = vcombine.low %v4801_v56, %v4817_v31  ;;  %v5138_v49 = vcombine.low %v4848_v29, %v4854_v16  ;;  %v5142_v54 = vcombine.low %v4878_v61, %v4897_v46  ;;  %v5146_v36 = vcombine.low %v4920_v60, %v4927_v7  ;;  %v5165_v61 = vld [vmem:[%s4541_s21 + $0xc4] sm:$0xf] }
  0x7f   : > { %3697 = vmatmul.mubr.msk.bf16.vlgmr.msra.gmra.mrb[0].mxu1 %vm723_vm3, %v4594_v38  ;;  %3849 = vmatmul.mubr.msk.bf16.gmra.mrb[16].mxu0 %vm723_vm3, %v5077_v20  ;;  %v5150_v45 = vcombine.low %v4950_v25, %v4959_v32  ;;  %v5154_v56 = vcombine.low %v4630_v14, %v4642_v28  ;;  %v5156_v31 = vcombine.low %v1342_v58, %v1345_v42  ;;  %v3354_v16 = vrot.slane %v4985_v17, 9  ;;  %v5714_v42 = vld [vmem:[#allocation11_spill] sm:$0xff] }
  0x80   : > { %3729 = vmatpush3.bf16.msra.mxu1 %v1459_v21  ;;  %3700 = vmatprep.mubr.msk.bf16.mxu1 %vm723_vm3, %v5083_v47  ;;  %v5160_v29 = vcombine.low %v4985_v17, %v4997_v53  ;;  %v1357_v7 = vrot.slane %v1355_v19, 4  ;;  %v1358_v60 = vrot.slane %v5003_v44, 5  ;;  %v1349_v14 = vsel %vm4769_vm7, %v3353_v40, %v1348_v51  ;;  %v5185_v17 = vld [vmem:[%s4541_s21 + $0xc0] sm:$0xf] }
  0x81   : > { %3852 = vmatprep.mubr.msk.bf16.mxu0 %vm723_vm3, %v5088_v0  ;;  %4227 = vmatprep.subr.msk.bf16.mxu1 %vm772_vm0, %v5095_v3  ;;  %v1352_v28 = vsel %vm4769_vm7, %v1350_v15, %v1351_v27  ;;  %v2091_v25 = vrot.slane %v5165_v61, 5  ;;  %v1356_v46 = vsel %vm4769_vm7, %v3354_v16, %v1355_v19  ;;  %v5190_v53 = vcombine.low %v4657_v48, %v4665_v52 }
  0x82   : > { %v1359_v32 = vsel %vm4769_vm7, %v1357_v7, %v1358_v60  ;;  %v5192_v44 = vcombine.low %v1349_v14, %v1352_v28  ;;  %v5196_v8 = vcombine.low %v4682_v13, %v4689_v24  ;;  %v1861_v43 = vshrl.u32 %v5185_v17, 16  ;;  %v3480_v60 = vld [vmem:[%s5652_s1 + $0x10] sm:$0x3]  ;;  %v4315_v14 = vld [vmem:[%s4541_s21 + $0x4] sm:$0xf] }
  0x83   : > { %v1864_v55 = vshll.u32 %v5185_v17, 16  ;;  %v1870_v12 = vshll.u32 %v5165_v61, 16  ;;  %v1874_v59 = vshrl.u32 %v5165_v61, 16  ;;  %v5202_v1 = vcombine.low %v1356_v46, %v1359_v32  ;;  %v4317_v32 = vld [vmem:[%s4541_s21] sm:$0xf] }
  0x84   : > { %v3424_v35 = vrot.slane %v5185_v17, 9  ;;  %v2093_v48 = vrot.slane %v2091_v25, 4  ;;  %v2094_v52 = vrot.slane %v281_v18, 5  ;;  %v1863_v2 = vrot.slane %v1861_v43, 4 }
  0x85   : > { %v1866_v4 = vrot.slane %v1864_v55, 5  ;;  %v1872_v11 = vrot.slane %v1870_v12, 5  ;;  %v1876_v21 = vrot.slane %v1874_v59, 4  ;;  %v1880_v9 = vshll.u32 %v281_v18, 16 }
  0x86   : > { %v2092_v10 = vsel %vm4769_vm7, %v3424_v35, %v2091_v25  ;;  %v2095_v51 = vsel %vm4769_vm7, %v2093_v48, %v2094_v52  ;;  %v5219_v40 = vcombine.low %v5714_v42, %v4716_v6  ;;  %v5715_v6 = vld [vmem:[#allocation21_spill] sm:$0xff]  ;;  %v1250_v28 = vrot.slane %v4315_v14, 5  ;;  %v4316_v25 = vld [vmem:[%s4541_s21 + $0x8] sm:$0x1]  ;;  %v5716_v48 = vld [vmem:[#allocation16_spill] sm:$0xff] }
  0x87   : > { %3701 = vmatmul.mubr.msk.bf16.gmra.mrb[4].mxu1 %vm723_vm3, %v5109_v23  ;;  %3853 = vmatmul.mubr.msk.bf16.gmra.mrb[20].mxu0 %vm723_vm3, %v5129_v62  ;;  %v1867_v13 = vor.u32 %v1866_v4, %v1863_v2  ;;  %v1877_v24 = vor.u32 %v1876_v21, %v1872_v11  ;;  %v1882_v58 = vrot.slane %v1880_v9, 5  ;;  %v5221_v19 = vcombine.low %v2092_v10, %v2095_v51  ;;  %v5717_v52 = vld [vmem:[#allocation18_spill] sm:$0xff]  ;;  %v5719_v4 = vld [vmem:[#allocation23_spill] sm:$0xff] }
  0x88   : > { %3704 = vmatprep.mubr.msk.bf16.mxu1 %vm723_vm3, %v5154_v56  ;;  %3856 = vmatprep.mubr.msk.bf16.mxu0 %vm723_vm3, %v5156_v31  ;;  %v2539_v7 = vsel %vm772_vm0, %v5715_v6, 0  ;;  %v1253_v46 = vrot.slane %v4316_v25, 5  ;;  %v3339_v18 = vrot.slane %v4317_v32, 9  ;;  %v1252_v43 = vrot.slane %v1250_v28, 4  ;;  %v4318_v2 = vld [vmem:[%s5652_s1 + $0x8] sm:$0x3] }
  0x89   : > { %v1868_v33 = vrot.slane %v1867_v13, 4  ;;  %v1878_v39 = vrot.slane %v1877_v24, 4  ;;  %v1665_v35 = vsel %vm772_vm0, %v5095_v3, 0  ;;  %v5718_v3 = vld [vmem:[#allocation20_spill] sm:$0xff]  ;;  %v5720_v21 = vld [vmem:[#allocation26_spill] sm:$0xff]  ;;  %v2751_v10 = vsel %vm772_vm0, %v3480_v60, 0 }
  0x8a   : > { %v1251_v55 = vsel %vm4769_vm7, %v3339_v18, %v1250_v28  ;;  %v1254_v12 = vsel %vm4769_vm7, %v1252_v43, %v1253_v46  ;;  %v5721_v13 = vld [vmem:[#allocation28_spill] sm:$0xff]  ;;  %v5316_v24 = vld [vmem:[%s4541_s21 + $0xcc] sm:$0xf]  ;;  %v5319_v9 = vld [vmem:[%s4541_s21 + $0xd0] sm:$0xf] }
  0x8b   : > { %v1873_v15 = vsel %vm4588_vm4, %v1868_v33, %v1872_v11  ;;  %v1883_v27 = vsel %vm4588_vm4, %v1878_v39, %v1882_v58  ;;  %v3356_v59 = vcombine.low %v1251_v55, %v1254_v12  ;;  %v5305_v11 = vcombine.low %v5185_v17, %v5165_v61  ;;  %v5722_v17 = vld [vmem:[#allocation9_spill] sm:$0xff]  ;;  %v5723_v51 = vld [vmem:[#allocation10_spill] sm:$0xff]  ;;  %v5724_v33 = vld [vmem:[#allocation12_spill] sm:$0xff] }
  0x8c   : > { %v5227_v16 = vcombine.low %v1873_v15, %v1883_v27  ;;  %v3444_v61 = vcombine.low %v5316_v24, %v5319_v9  ;;  %v5725_v39 = vld [vmem:[#allocation13_spill] sm:$0xff]  ;;  %v5726_v58 = vld [vmem:[#allocation14_spill] sm:$0xff]  ;;  %v5727_v42 = vld [vmem:[#allocation15_spill] sm:$0xff]  ;;  %v2510_v14 = vshll.u32 %v5316_v24, 16  ;;  %v2520_v28 = vshrl.u32 %v5319_v9, 16 }
  0x8d   : > { %v5728_v15 = vld [vmem:[#allocation17_spill] sm:$0xff]  ;;  %v5729_v27 = vld [vmem:[#allocation19_spill] sm:$0xff]  ;;  %v5730_v6 = vld [vmem:[#allocation22_spill] sm:$0xff]  ;;  %v2737_v34 = vrot.slane %v5319_v9, 5 }
  0x8e   : > { %v5732_v25 = vld [vmem:[#allocation8_spill] sm:$0xff]  ;;  %v5733_v46 = vld [vmem:[#allocation25_spill] sm:$0xff]  ;;  %v2512_v32 = vrot.slane %v2510_v14, 5  ;;  %v2522_v43 = vrot.slane %v2520_v28, 4  ;;  %v5734_v12 = vld [vmem:[#allocation27_spill] sm:$0xff] }
  0x8f   : > { %3705 = vmatmul.mubr.msk.bf16.gmra.mrb[8].mxu1 %vm723_vm3, %v5190_v53  ;;  %3857 = vmatmul.mubr.msk.bf16.gmra.mrb[24].mxu0 %vm723_vm3, %v5192_v44  ;;  %v284_v55 = vld [vmem:[%s4541_s21 + $0xd4] sm:$0x1] }
  0x90   : > { %3708 = vmatprep.mubr.msk.bf16.mxu1 %vm723_vm3, %v5196_v8  ;;  %3860 = vmatprep.mubr.msk.bf16.mxu0 %vm723_vm3, %v5202_v1 }
  0x97   : > { %3709 = vmatmul.mubr.msk.bf16.gmra.mrb[12].mxu1 %vm723_vm3, %v5219_v40  ;;  %3861 = vmatmul.mubr.msk.bf16.gmra.mrb[28].mxu0 %vm723_vm3, %v5221_v19 }
  0x98   : > { %3712 = vmatprep.mubr.msk.bf16.mxu1 %vm723_vm3, %v5115_v22  ;;  %3866 = vmatprep.mubr.msk.bf16.mxu0 %vm723_vm3, %v5083_v47 }
  0x9f   : > { %3713 = vmatmul.mubr.msk.bf16.gmra.mrb[16].mxu1 %vm723_vm3, %v5125_v57  ;;  %3867 = vmatmul.mubr.msk.bf16.vlgmr.msra.gmra.mrb[0].mxu0 %vm723_vm3, %v5109_v23 }
  0xa0   : > { %3899 = vmatpush3.bf16.msra.mxu0 %v2539_v7  ;;  %3716 = vmatprep.mubr.msk.bf16.mxu1 %vm723_vm3, %v5134_v5  ;;  %v5731_v7 = vld [vmem:[#allocation24_spill] sm:$0xff] }
  0xa1   : > { %3870 = vmatprep.mubr.msk.bf16.mxu0 %vm723_vm3, %v5154_v56  ;;  %4233 = vmatprep.subr.msk.bf16.mxu0 %vm772_vm0, %v3480_v60  ;;  %v2507_v60 = vshrl.u32 %v5316_v24, 16 }
  0xa7   : > { %3717 = vmatmul.mubr.msk.bf16.gmra.mrb[20].mxu1 %vm723_vm3, %v5138_v49  ;;  %3871 = vmatmul.mubr.msk.bf16.gmra.mrb[4].mxu0 %vm723_vm3, %v5190_v53 }
  0xa8   : > { %3720 = vmatprep.mubr.msk.bf16.mxu1 %vm723_vm3, %v5142_v54  ;;  %3874 = vmatprep.mubr.msk.bf16.mxu0 %vm723_vm3, %v5196_v8 }
  0xaf   : > { %3721 = vmatmul.mubr.msk.bf16.gmra.mrb[24].mxu1 %vm723_vm3, %v5146_v36  ;;  %3875 = vmatmul.mubr.msk.bf16.gmra.mrb[8].mxu0 %vm723_vm3, %v5219_v40 }
  0xb0   : > { %3724 = vmatprep.mubr.msk.bf16.mxu1 %vm723_vm3, %v5150_v45  ;;  %3878 = vmatprep.mubr.msk.bf16.mxu0 %vm723_vm3, %v5115_v22 }
  0xb7   : > { %3725 = vmatmul.mubr.msk.bf16.gmra.mrb[28].mxu1 %vm723_vm3, %v5160_v29  ;;  %3879 = vmatmul.mubr.msk.bf16.gmra.mrb[12].mxu0 %vm723_vm3, %v5125_v57 }
  0xb8   : > { %3730 = vmatprep.mubr.msk.bf16.mxu1 %vm723_vm3, %v3356_v59  ;;  %3882 = vmatprep.mubr.msk.bf16.mxu0 %vm723_vm3, %v5134_v5 }
  0xbf   : > { %3731 = vmatmul.mubr.msk.bf16.vlgmr.msra.gmra.mrb[0].mxu1 %vm723_vm3, %v5716_v48  ;;  %3883 = vmatmul.mubr.msk.bf16.gmra.mrb[16].mxu0 %vm723_vm3, %v5138_v49 }
  0xc0   : > { %3763 = vmatpush3.bf16.msra.mxu1 %v1665_v35  ;;  %3734 = vmatprep.mubr.msk.bf16.mxu1 %vm723_vm3, %v5717_v52  ;;  %v2526_v35 = vshll.u32 %v284_v55, 16 }
  0xc1   : > { %3886 = vmatprep.mubr.msk.bf16.mxu0 %vm723_vm3, %v5142_v54  ;;  %4229 = vmatprep.subr.msk.bf16.mxu1 %vm772_vm0, %v4318_v2 }
  0xc7   : > { %3735 = vmatmul.mubr.msk.bf16.gmra.mrb[4].mxu1 %vm723_vm3, %v5718_v3  ;;  %3887 = vmatmul.mubr.msk.bf16.gmra.mrb[20].mxu0 %vm723_vm3, %v5146_v36 }
  0xc8   : > { %3738 = vmatprep.mubr.msk.bf16.mxu1 %vm723_vm3, %v5719_v4  ;;  %3890 = vmatprep.mubr.msk.bf16.mxu0 %vm723_vm3, %v5150_v45 }
  0xcf   : > { %3739 = vmatmul.mubr.msk.bf16.gmra.mrb[8].mxu1 %vm723_vm3, %v5720_v21  ;;  %3891 = vmatmul.mubr.msk.bf16.gmra.mrb[24].mxu0 %vm723_vm3, %v5160_v29 }
  0xd0   : > { %3742 = vmatprep.mubr.msk.bf16.mxu1 %vm723_vm3, %v5721_v13  ;;  %3894 = vmatprep.mubr.msk.bf16.mxu0 %vm723_vm3, %v5305_v11 }
  0xd7   : > { %3743 = vmatmul.mubr.msk.bf16.gmra.mrb[12].mxu1 %vm723_vm3, %v5020_v37  ;;  %3895 = vmatmul.mubr.msk.bf16.gmra.mrb[28].mxu0 %vm723_vm3, %v3444_v61  ;;  %v2528_v61 = vrot.slane %v2526_v35, 5 }
  0xd8   : > { %3746 = vmatprep.mubr.msk.bf16.mxu1 %vm723_vm3, %v5051_v41  ;;  %3900 = vmatprep.mubr.msk.bf16.mxu0 %vm723_vm3, %v5722_v17 }
  0xdf   : > { %3747 = vmatmul.mubr.msk.bf16.gmra.mrb[16].mxu1 %vm723_vm3, %v5055_v50  ;;  %3901 = vmatmul.mubr.msk.bf16.vlgmr.msra.gmra.mrb[0].mxu0 %vm723_vm3, %v5723_v51 }
  0xe0   : > { %3933 = vmatpush3.bf16.msra.mxu0 %v2751_v10  ;;  %3750 = vmatprep.mubr.msk.bf16.mxu1 %vm723_vm3, %v5077_v20 }
  0xe1   : > { %3904 = vmatprep.mubr.msk.bf16.mxu0 %vm723_vm3, %v5724_v33 }
  0xe7   : > { %3751 = vmatmul.mubr.msk.bf16.gmra.mrb[20].mxu1 %vm723_vm3, %v5088_v0  ;;  %3905 = vmatmul.mubr.msk.bf16.gmra.mrb[4].mxu0 %vm723_vm3, %v5725_v39 }
  0xe8   : > { %3754 = vmatprep.mubr.msk.bf16.mxu1 %vm723_vm3, %v5129_v62  ;;  %3908 = vmatprep.mubr.msk.bf16.mxu0 %vm723_vm3, %v5726_v58 }
  0xef   : > { %3755 = vmatmul.mubr.msk.bf16.gmra.mrb[24].mxu1 %vm723_vm3, %v5156_v31  ;;  %3909 = vmatmul.mubr.msk.bf16.gmra.mrb[8].mxu0 %vm723_vm3, %v5727_v42 }
  0xf0   : > { %3758 = vmatprep.mubr.msk.bf16.mxu1 %vm723_vm3, %v5192_v44  ;;  %3912 = vmatprep.mubr.msk.bf16.mxu0 %vm723_vm3, %v5728_v15 }
  0xf7   : > { %3759 = vmatmul.mubr.msk.bf16.gmra.mrb[28].mxu1 %vm723_vm3, %v5202_v1  ;;  %3913 = vmatmul.mubr.msk.bf16.gmra.mrb[12].mxu0 %vm723_vm3, %v5729_v27 }
  0xf8   : > { %3764 = vmatprep.mubr.msk.bf16.mxu1 %vm723_vm3, %v4594_v38  ;;  %3916 = vmatprep.mubr.msk.bf16.mxu0 %vm723_vm3, %v5730_v6  ;;  %v2516_v38 = vshll.u32 %v5319_v9, 16 }
  0xfa   : > { %v2518_v18 = vrot.slane %v2516_v38, 5 }
  0xfc   : > { %v2523_v59 = vor.u32 %v2522_v43, %v2518_v18 }
  0xfe   : > { %v2524_v2 = vrot.slane %v2523_v59, 4 }
  0xff   : > { %3765 = vmatmul.mubr.msk.bf16.vlgmr.msra.gmra.mrb[0].mxu1 %vm723_vm3, %v5083_v47  ;;  %3917 = vmatmul.mubr.msk.bf16.gmra.mrb[16].mxu0 %vm723_vm3, %v5731_v7  ;;  %v2509_v47 = vrot.slane %v2507_v60, 4 }
 0x100   : > { %3967 = vmatpush3.bf16.msra.mxu1 %v5732_v25  ;;  %3768 = vmatprep.mubr.msk.bf16.mxu1 %vm723_vm3, %v5109_v23 }
 0x101   : > { %3920 = vmatprep.mubr.msk.bf16.mxu0 %vm723_vm3, %v5733_v46  ;;  %v2513_v23 = vor.u32 %v2512_v32, %v2509_v47 }
 0x103   : > { %v2514_v48 = vrot.slane %v2513_v23, 4 }
 0x107   : > { %3769 = vmatmul.mubr.msk.bf16.gmra.mrb[4].mxu1 %vm723_vm3, %v5154_v56  ;;  %3921 = vmatmul.mubr.msk.bf16.gmra.mrb[20].mxu0 %vm723_vm3, %v5734_v12  ;;  %v2519_v56 = vsel %vm4588_vm4, %v2514_v48, %v2518_v18 }
 0x108   : > { %3772 = vmatprep.mubr.msk.bf16.mxu1 %vm723_vm3, %v5190_v53  ;;  %3924 = vmatprep.mubr.msk.bf16.mxu0 %vm723_vm3, %v5022_v30  ;;  %v2529_v53 = vsel %vm4588_vm4, %v2524_v2, %v2528_v61 }
 0x109   : > { %v3462_v17 = vcombine.low %v2519_v56, %v2529_v53 }
 0x10f   : > { %3773 = vmatmul.mubr.msk.bf16.gmra.mrb[8].mxu1 %vm723_vm3, %v5196_v8  ;;  %3925 = vmatmul.mubr.msk.bf16.gmra.mrb[24].mxu0 %vm723_vm3, %v5049_v63 }
 0x110   : > { %3776 = vmatprep.mubr.msk.bf16.mxu1 %vm723_vm3, %v5219_v40  ;;  %3928 = vmatprep.mubr.msk.bf16.mxu0 %vm723_vm3, %v5227_v16 }
 0x117   : > { %3777 = vmatmul.mubr.msk.bf16.gmra.mrb[12].mxu1 %vm723_vm3, %v5115_v22  ;;  %3929 = vmatmul.mubr.msk.bf16.gmra.mrb[28].mxu0 %vm723_vm3, %v3462_v17 }
 0x118   : > { %3780 = vmatprep.mubr.msk.bf16.mxu1 %vm723_vm3, %v5125_v57  ;;  %3934 = vmatprep.mubr.msk.bf16.mxu0 %vm723_vm3, %v5717_v52 }
 0x11f   : > { %3781 = vmatmul.mubr.msk.bf16.gmra.mrb[16].mxu1 %vm723_vm3, %v5134_v5  ;;  %3935 = vmatmul.mubr.msk.bf16.vlgmr.msra.gmra.mrb[0].mxu0 %vm723_vm3, %v5718_v3 }
 0x120   : > { %3784 = vmatprep.mubr.msk.bf16.mxu1 %vm723_vm3, %v5138_v49  ;;  %3938 = vmatprep.mubr.msk.bf16.mxu0 %vm723_vm3, %v5719_v4 }
 0x127   : > { %3785 = vmatmul.mubr.msk.bf16.gmra.mrb[20].mxu1 %vm723_vm3, %v5142_v54  ;;  %3939 = vmatmul.mubr.msk.bf16.gmra.mrb[4].mxu0 %vm723_vm3, %v5720_v21 }
 0x128   : > { %3788 = vmatprep.mubr.msk.bf16.mxu1 %vm723_vm3, %v5146_v36  ;;  %3942 = vmatprep.mubr.msk.bf16.mxu0 %vm723_vm3, %v5721_v13 }
 0x12f   : > { %3789 = vmatmul.mubr.msk.bf16.gmra.mrb[24].mxu1 %vm723_vm3, %v5150_v45  ;;  %3943 = vmatmul.mubr.msk.bf16.gmra.mrb[8].mxu0 %vm723_vm3, %v5020_v37  ;;  %v3479_v37 = vrot.slane %v5316_v24, 9 }
 0x130   : > { %3792 = vmatprep.mubr.msk.bf16.mxu1 %vm723_vm3, %v5160_v29  ;;  %3946 = vmatprep.mubr.msk.bf16.mxu0 %vm723_vm3, %v5051_v41  ;;  %v2739_v41 = vrot.slane %v2737_v34, 4 }
 0x137   : > { %3793 = vmatmul.mubr.msk.bf16.gmra.mrb[28].mxu1 %vm723_vm3, %v5305_v11  ;;  %3947 = vmatmul.mubr.msk.bf16.gmra.mrb[12].mxu0 %vm723_vm3, %v5055_v50  ;;  %v2740_v50 = vrot.slane %v284_v55, 5 }
 0x138   : > { %3814 = vmatprep.mubr.msk.bf16.mxu1 %vm723_vm3, %v5729_v27  ;;  %3950 = vmatprep.mubr.msk.bf16.mxu0 %vm723_vm3, %v5077_v20  ;;  %v2738_v20 = vsel %vm4769_vm7, %v3479_v37, %v2737_v34 }
 0x13f   : > { %3815 = vmatmul.mubr.msk.bf16.vlgmr.msra.gmra.mrb[16].mxu1 %vm723_vm3, %v5730_v6  ;;  %3951 = vmatmul.mubr.msk.bf16.gmra.mrb[16].mxu0 %vm723_vm3, %v5088_v0  ;;  %v2741_v0 = vsel %vm4769_vm7, %v2739_v41, %v2740_v50 }
 0x140   : > { %3818 = vmatprep.mubr.msk.bf16.mxu1 %vm723_vm3, %v5731_v7  ;;  %3954 = vmatprep.mubr.msk.bf16.mxu0 %vm723_vm3, %v5129_v62  ;;  %v3481_v22 = vcombine.low %v2738_v20, %v2741_v0 }
 0x147   : > { %3819 = vmatmul.mubr.msk.bf16.gmra.mrb[20].mxu1 %vm723_vm3, %v5733_v46  ;;  %3955 = vmatmul.mubr.msk.bf16.gmra.mrb[20].mxu0 %vm723_vm3, %v5156_v31 }
 0x148   : > { %3822 = vmatprep.mubr.msk.bf16.mxu1 %vm723_vm3, %v5734_v12  ;;  %3958 = vmatprep.mubr.msk.bf16.mxu0 %vm723_vm3, %v5192_v44 }
 0x14f   : > { %3823 = vmatmul.mubr.msk.bf16.gmra.mrb[24].mxu1 %vm723_vm3, %v5022_v30  ;;  %3959 = vmatmul.mubr.msk.bf16.gmra.mrb[24].mxu0 %vm723_vm3, %v5202_v1 }
 0x150   : > { %3826 = vmatprep.mubr.msk.bf16.mxu1 %vm723_vm3, %v5049_v63  ;;  %3962 = vmatprep.mubr.msk.bf16.mxu0 %vm723_vm3, %v5221_v19 }
 0x157   : > { %3827 = vmatmul.mubr.msk.bf16.gmra.mrb[28].mxu1 %vm723_vm3, %v5227_v16  ;;  %3963 = vmatmul.mubr.msk.bf16.gmra.mrb[28].mxu0 %vm723_vm3, %v3481_v22  ;;  %v5490_v16 = vld [vmem:[%s5653_s2] ss:$0 sm:$0xff] }
 0x1d2   : > { %v3766_v30 = vpop.f32.mrb[0].mxu1 }
 0x1d3   : > { %v1701_v57 = vpop.f32.mrb[1].mxu1 }
 0x1d4   : > { %v3767_v62 = vpop.f32.mrb[2].mxu1 }
 0x1d5   : > { %v1704_v63 = vpop.f32.mrb[3].mxu1 }
 0x1da   : > { %v3770_v5 = vpop.f32.mrb[4].mxu1 }
 0x1db   : > { %v1717_v49 = vpop.f32.mrb[5].mxu1 }
 0x1dc   : > { %v3771_v54 = vpop.f32.mrb[6].mxu1 }
 0x1dd   : > { %v1720_v36 = vpop.f32.mrb[7].mxu1 }
 0x1e2   : > { %v3774_v45 = vpop.f32.mrb[8].mxu1 }
 0x1e3   : > { %v5469_v31 = vpop.f32.mrb[9].mxu1 }
 0x1e4   : > { %v5471_v26 = vpop.f32.mrb[10].mxu1 }
 0x1e5   : > { %v5473_v29 = vpop.f32.mrb[11].mxu1 }
 0x1ea   : > { %v5475_v44 = vpop.f32.mrb[12].mxu1 }
 0x1eb   : > { %v5477_v8 = vpop.f32.mrb[13].mxu1 }
 0x1ec   : > { %v5479_v1 = vpop.f32.mrb[14].mxu1 }
 0x1ed   : > { %v5481_v40 = vpop.f32.mrb[15].mxu1 }
 0x1f2   : > { %v3936_v19 = vpop.f32.mrb[0].mxu0 }
 0x1f3   : > { %v3968_v52 = vadd.f32 %v3936_v19, %v3766_v30  ;;  %v2787_v3 = vpop.f32.mrb[1].mxu0 }
 0x1f4   : > { %v3969_v4 = vadd.f32 %v2787_v3, %v1701_v57  ;;  %v3937_v11 = vpop.f32.mrb[2].mxu0 }
 0x1f5   : > { %v2955_v21 = vadd.f32 %v3968_v52, %v5490_v16  ;;  %v3970_v13 = vadd.f32 %v3937_v11, %v3767_v62  ;;  %v2790_v24 = vpop.f32.mrb[3].mxu0 }
 0x1f6   : > { %v2953_v9 = vadd.f32 %v3969_v4, %v5490_v16  ;;  %v3971_v10 = vadd.f32 %v2790_v24, %v1704_v63 }
 0x1f7   : > { %2987 = vst [vmem:[%s5494_s22 + $0x10] sm:$0xff] %v2955_v21  ;;  %v2956_v51 = vadd.f32 %v3970_v13, %v5490_v16  ;;  %v3056_v7 = vmul.f32 %v2955_v21, %v2955_v21 }
 0x1f8   : > { %2985 = vst [vmem:[%s5494_s22] sm:$0xff] %v2953_v9  ;;  %v2954_v33 = vadd.f32 %v3971_v10, %v5490_v16  ;;  %v3054_v39 = vmul.f32 %v2953_v9, %v2953_v9 }
 0x1f9   : > { %2988 = vst [vmem:[%s5494_s22 + $0x18] sm:$0xff] %v2956_v51  ;;  %v3057_v38 = vmul.f32 %v2956_v51, %v2956_v51 }
 0x1fa   : > { %2986 = vst [vmem:[%s5494_s22 + $0x8] sm:$0xff] %v2954_v33  ;;  %v3017_v58 = vadd.f32 %v2954_v33, %v2953_v9  ;;  %v3055_v42 = vmul.f32 %v2954_v33, %v2954_v33  ;;  %v3940_v15 = vpop.f32.mrb[4].mxu0 }
 0x1fb   : > { %v3972_v27 = vadd.f32 %v3940_v15, %v3770_v5  ;;  %v2803_v6 = vpop.f32.mrb[5].mxu0 }
 0x1fc   : > { %v3018_v60 = vadd.f32 %v3017_v58, %v2955_v21  ;;  %v3086_v14 = vadd.f32 %v3055_v42, %v3054_v39  ;;  %v3973_v28 = vadd.f32 %v2803_v6, %v1717_v49  ;;  %v3941_v25 = vpop.f32.mrb[6].mxu0 }
 0x1fd   : > { %v2959_v46 = vadd.f32 %v3972_v27, %v5490_v16  ;;  %v3974_v47 = vadd.f32 %v3941_v25, %v3771_v54  ;;  %v2806_v32 = vpop.f32.mrb[7].mxu0 }
 0x1fe   : > { %v3087_v18 = vadd.f32 %v3086_v14, %v3056_v7  ;;  %v2957_v43 = vadd.f32 %v3973_v28, %v5490_v16  ;;  %v3019_v55 = vadd.f32 %v3018_v60, %v2956_v51  ;;  %v3975_v12 = vadd.f32 %v2806_v32, %v1720_v36 }
 0x1ff   : > { %2991 = vst [vmem:[%s5494_s22 + $0x30] sm:$0xff] %v2959_v46  ;;  %v2960_v23 = vadd.f32 %v3974_v47, %v5490_v16  ;;  %v3060_v41 = vmul.f32 %v2959_v46, %v2959_v46 }
 0x200   : > { %2989 = vst [vmem:[%s5494_s22 + $0x20] sm:$0xff] %v2957_v43  ;;  %v3020_v59 = vadd.f32 %v3019_v55, %v2957_v43  ;;  %v3058_v35 = vmul.f32 %v2957_v43, %v2957_v43  ;;  %v3088_v48 = vadd.f32 %v3087_v18, %v3057_v38  ;;  %v2958_v2 = vadd.f32 %v3975_v12, %v5490_v16 }
 0x201   : > { %2992 = vst [vmem:[%s5494_s22 + $0x38] sm:$0xff] %v2960_v23  ;;  %v3061_v30 = vmul.f32 %v2960_v23, %v2960_v23 }
 0x202   : > { %v3089_v61 = vadd.f32 %v3088_v48, %v3058_v35  ;;  %2990 = vst [vmem:[%s5494_s22 + $0x28] sm:$0xff] %v2958_v2  ;;  %v3021_v56 = vadd.f32 %v3020_v59, %v2958_v2  ;;  %v3059_v53 = vmul.f32 %v2958_v2, %v2958_v2  ;;  %v3944_v17 = vpop.f32.mrb[8].mxu0 }
 0x203   : > { %v3976_v34 = vadd.f32 %v3944_v17, %v3774_v45  ;;  %v2819_v37 = vpop.f32.mrb[9].mxu0 }
 0x204   : > { %v3022_v50 = vadd.f32 %v3021_v56, %v2959_v46  ;;  %v3090_v20 = vadd.f32 %v3089_v61, %v3059_v53  ;;  %v3977_v0 = vadd.f32 %v2819_v37, %v5469_v31  ;;  %v3945_v22 = vpop.f32.mrb[10].mxu0 }
 0x205   : > { %v2963_v57 = vadd.f32 %v3976_v34, %v5490_v16  ;;  %v3978_v62 = vadd.f32 %v3945_v22, %v5471_v26  ;;  %v2822_v63 = vpop.f32.mrb[11].mxu0 }
 0x206   : > { %v3091_v5 = vadd.f32 %v3090_v20, %v3060_v41  ;;  %v2961_v49 = vadd.f32 %v3977_v0, %v5490_v16  ;;  %v3023_v54 = vadd.f32 %v3022_v50, %v2960_v23  ;;  %v3979_v36 = vadd.f32 %v2822_v63, %v5473_v29 }
 0x207   : > { %2995 = vst [vmem:[%s5494_s22 + $0x50] sm:$0xff] %v2963_v57  ;;  %v2964_v45 = vadd.f32 %v3978_v62, %v5490_v16  ;;  %v3064_v29 = vmul.f32 %v2963_v57, %v2963_v57 }
 0x208   : > { %2993 = vst [vmem:[%s5494_s22 + $0x40] sm:$0xff] %v2961_v49  ;;  %v3024_v31 = vadd.f32 %v3023_v54, %v2961_v49  ;;  %v3062_v19 = vmul.f32 %v2961_v49, %v2961_v49  ;;  %v3092_v52 = vadd.f32 %v3091_v5, %v3061_v30  ;;  %v2962_v3 = vadd.f32 %v3979_v36, %v5490_v16 }
 0x209   : > { %2996 = vst [vmem:[%s5494_s22 + $0x58] sm:$0xff] %v2964_v45  ;;  %v3065_v39 = vmul.f32 %v2964_v45, %v2964_v45 }
 0x20a   : > { %v3093_v4 = vadd.f32 %v3092_v52, %v3062_v19  ;;  %2994 = vst [vmem:[%s5494_s22 + $0x48] sm:$0xff] %v2962_v3  ;;  %v3025_v26 = vadd.f32 %v3024_v31, %v2962_v3  ;;  %v3063_v11 = vmul.f32 %v2962_v3, %v2962_v3  ;;  %v3948_v21 = vpop.f32.mrb[12].mxu0 }
 0x20b   : > { %v3980_v13 = vadd.f32 %v3948_v21, %v5475_v44  ;;  %v2835_v24 = vpop.f32.mrb[13].mxu0 }
 0x20c   : > { %v3026_v9 = vadd.f32 %v3025_v26, %v2963_v57  ;;  %v3094_v10 = vadd.f32 %v3093_v4, %v3063_v11  ;;  %v3981_v51 = vadd.f32 %v2835_v24, %v5477_v8  ;;  %v3949_v33 = vpop.f32.mrb[14].mxu0 }
 0x20d   : > { %v2967_v58 = vadd.f32 %v3980_v13, %v5490_v16  ;;  %v3982_v42 = vadd.f32 %v3949_v33, %v5479_v1  ;;  %v2838_v15 = vpop.f32.mrb[15].mxu0 }
 0x20e   : > { %v3095_v27 = vadd.f32 %v3094_v10, %v3064_v29  ;;  %v2965_v6 = vadd.f32 %v3981_v51, %v5490_v16  ;;  %v3027_v44 = vadd.f32 %v3026_v9, %v2964_v45  ;;  %v3983_v7 = vadd.f32 %v2838_v15, %v5481_v40 }
 0x20f   : > { %2999 = vst [vmem:[%s5494_s22 + $0x70] sm:$0xff] %v2967_v58  ;;  %v2968_v60 = vadd.f32 %v3982_v42, %v5490_v16  ;;  %v3068_v40 = vmul.f32 %v2967_v58, %v2967_v58 }
 0x210   : > { %2997 = vst [vmem:[%s5494_s22 + $0x60] sm:$0xff] %v2965_v6  ;;  %v3028_v8 = vadd.f32 %v3027_v44, %v2965_v6  ;;  %v3066_v14 = vmul.f32 %v2965_v6, %v2965_v6  ;;  %v3096_v28 = vadd.f32 %v3095_v27, %v3065_v39  ;;  %v2966_v25 = vadd.f32 %v3983_v7, %v5490_v16 }
 0x211   : > { %3000 = vst [vmem:[%s5494_s22 + $0x78] sm:$0xff] %v2968_v60  ;;  %v3069_v2 = vmul.f32 %v2968_v60, %v2968_v60 }
 0x212   : > { %v3097_v38 = vadd.f32 %v3096_v28, %v3066_v14  ;;  %2998 = vst [vmem:[%s5494_s22 + $0x68] sm:$0xff] %v2966_v25  ;;  %v3029_v1 = vadd.f32 %v3028_v8, %v2966_v25  ;;  %v3067_v46 = vmul.f32 %v2966_v25, %v2966_v25  ;;  %v3816_v47 = vpop.f32.mrb[16].mxu1  ;;  %v3952_v32 = vpop.f32.mrb[16].mxu0 }
 0x213   : > { %v3984_v18 = vadd.f32 %v3952_v32, %v3816_v47  ;;  %v1993_v43 = vpop.f32.mrb[17].mxu1  ;;  %v2851_v55 = vpop.f32.mrb[17].mxu0 }
 0x214   : > { %v3030_v12 = vadd.f32 %v3029_v1, %v2967_v58  ;;  %v3098_v23 = vadd.f32 %v3097_v38, %v3067_v46  ;;  %v3985_v59 = vadd.f32 %v2851_v55, %v1993_v43  ;;  %v3817_v35 = vpop.f32.mrb[18].mxu1  ;;  %v3953_v48 = vpop.f32.mrb[18].mxu0 }
 0x215   : > { %v2971_v61 = vadd.f32 %v3984_v18, %v5490_v16  ;;  %v3986_v56 = vadd.f32 %v3953_v48, %v3817_v35  ;;  %v1996_v53 = vpop.f32.mrb[19].mxu1  ;;  %v2854_v17 = vpop.f32.mrb[19].mxu0 }
 0x216   : > { %v3099_v34 = vadd.f32 %v3098_v23, %v3068_v40  ;;  %v2969_v37 = vadd.f32 %v3985_v59, %v5490_v16  ;;  %v3031_v41 = vadd.f32 %v3030_v12, %v2968_v60  ;;  %v3987_v50 = vadd.f32 %v2854_v17, %v1996_v53 }
 0x217   : > { %3003 = vst [vmem:[%s5494_s22 + $0x90] sm:$0xff] %v2971_v61  ;;  %v2972_v20 = vadd.f32 %v3986_v56, %v5490_v16  ;;  %v3072_v19 = vmul.f32 %v2971_v61, %v2971_v61 }
 0x218   : > { %3001 = vst [vmem:[%s5494_s22 + $0x80] sm:$0xff] %v2969_v37  ;;  %v3032_v0 = vadd.f32 %v3031_v41, %v2969_v37  ;;  %v3070_v22 = vmul.f32 %v2969_v37, %v2969_v37  ;;  %v3100_v30 = vadd.f32 %v3099_v34, %v3069_v2  ;;  %v2970_v57 = vadd.f32 %v3987_v50, %v5490_v16 }
 0x219   : > { %3004 = vst [vmem:[%s5494_s22 + $0x98] sm:$0xff] %v2972_v20  ;;  %v3073_v21 = vmul.f32 %v2972_v20, %v2972_v20 }
 0x21a   : > { %v3101_v62 = vadd.f32 %v3100_v30, %v3070_v22  ;;  %3002 = vst [vmem:[%s5494_s22 + $0x88] sm:$0xff] %v2970_v57  ;;  %v3033_v63 = vadd.f32 %v3032_v0, %v2970_v57  ;;  %v3071_v5 = vmul.f32 %v2970_v57, %v2970_v57  ;;  %v3820_v49 = vpop.f32.mrb[20].mxu1  ;;  %v3956_v54 = vpop.f32.mrb[20].mxu0 }
 0x21b   : > { %v3988_v36 = vadd.f32 %v3956_v54, %v3820_v49  ;;  %v2009_v45 = vpop.f32.mrb[21].mxu1  ;;  %v2867_v31 = vpop.f32.mrb[21].mxu0 }
 0x21c   : > { %v3034_v52 = vadd.f32 %v3033_v63, %v2971_v61  ;;  %v3102_v3 = vadd.f32 %v3101_v62, %v3071_v5  ;;  %v3989_v4 = vadd.f32 %v2867_v31, %v2009_v45  ;;  %v3821_v26 = vpop.f32.mrb[22].mxu1  ;;  %v3957_v11 = vpop.f32.mrb[22].mxu0 }
 0x21d   : > { %v2975_v13 = vadd.f32 %v3988_v36, %v5490_v16  ;;  %v3990_v24 = vadd.f32 %v3957_v11, %v3821_v26  ;;  %v2012_v29 = vpop.f32.mrb[23].mxu1  ;;  %v2870_v9 = vpop.f32.mrb[23].mxu0 }
 0x21e   : > { %v3103_v10 = vadd.f32 %v3102_v3, %v3072_v19  ;;  %v2973_v51 = vadd.f32 %v3989_v4, %v5490_v16  ;;  %v3035_v33 = vadd.f32 %v3034_v52, %v2972_v20  ;;  %v3991_v39 = vadd.f32 %v2870_v9, %v2012_v29 }
 0x21f   : > { %3007 = vst [vmem:[%s5494_s22 + $0xb0] sm:$0xff] %v2975_v13  ;;  %v2976_v58 = vadd.f32 %v3990_v24, %v5490_v16  ;;  %v3076_v1 = vmul.f32 %v2975_v13, %v2975_v13 }
 0x220   : > { %3005 = vst [vmem:[%s5494_s22 + $0xa0] sm:$0xff] %v2973_v51  ;;  %v3036_v42 = vadd.f32 %v3035_v33, %v2973_v51  ;;  %v3074_v15 = vmul.f32 %v2973_v51, %v2973_v51  ;;  %v3104_v27 = vadd.f32 %v3103_v10, %v3073_v21  ;;  %v2974_v6 = vadd.f32 %v3991_v39, %v5490_v16 }
 0x221   : > { %3008 = vst [vmem:[%s5494_s22 + $0xb8] sm:$0xff] %v2976_v58  ;;  %v3077_v55 = vmul.f32 %v2976_v58, %v2976_v58 }
 0x222   : > { %v3105_v44 = vadd.f32 %v3104_v27, %v3074_v15  ;;  %3006 = vst [vmem:[%s5494_s22 + $0xa8] sm:$0xff] %v2974_v6  ;;  %v3037_v7 = vadd.f32 %v3036_v42, %v2974_v6  ;;  %v3075_v60 = vmul.f32 %v2974_v6, %v2974_v6  ;;  %v3824_v8 = vpop.f32.mrb[24].mxu1  ;;  %v3960_v14 = vpop.f32.mrb[24].mxu0 }
 0x223   : > { %v3992_v28 = vadd.f32 %v3960_v14, %v3824_v8  ;;  %v2025_v25 = vpop.f32.mrb[25].mxu1  ;;  %v2883_v38 = vpop.f32.mrb[25].mxu0 }
 0x224   : > { %v3038_v46 = vadd.f32 %v3037_v7, %v2975_v13  ;;  %v3106_v47 = vadd.f32 %v3105_v44, %v3075_v60  ;;  %v3993_v32 = vadd.f32 %v2883_v38, %v2025_v25  ;;  %v3825_v18 = vpop.f32.mrb[26].mxu1  ;;  %v3961_v43 = vpop.f32.mrb[26].mxu0 }
 0x225   : > { %v2979_v40 = vadd.f32 %v3992_v28, %v5490_v16  ;;  %v3994_v12 = vadd.f32 %v3961_v43, %v3825_v18  ;;  %v2028_v23 = vpop.f32.mrb[27].mxu1  ;;  %v2886_v59 = vpop.f32.mrb[27].mxu0 }
 0x226   : > { %v3107_v35 = vadd.f32 %v3106_v47, %v3076_v1  ;;  %v2977_v48 = vadd.f32 %v3993_v32, %v5490_v16  ;;  %v3039_v2 = vadd.f32 %v3038_v46, %v2976_v58  ;;  %v3995_v61 = vadd.f32 %v2886_v59, %v2028_v23 }
 0x227   : > { %3011 = vst [vmem:[%s5494_s22 + $0xd0] sm:$0xff] %v2979_v40  ;;  %v2980_v56 = vadd.f32 %v3994_v12, %v5490_v16  ;;  %v3080_v63 = vmul.f32 %v2979_v40, %v2979_v40 }
 0x228   : > { %3009 = vst [vmem:[%s5494_s22 + $0xc0] sm:$0xff] %v2977_v48  ;;  %v3040_v53 = vadd.f32 %v3039_v2, %v2977_v48  ;;  %v3078_v17 = vmul.f32 %v2977_v48, %v2977_v48  ;;  %v3108_v34 = vadd.f32 %v3107_v35, %v3077_v55  ;;  %v2978_v37 = vadd.f32 %v3995_v61, %v5490_v16 }
 0x229   : > { %3012 = vst [vmem:[%s5494_s22 + $0xd8] sm:$0xff] %v2980_v56  ;;  %v3081_v31 = vmul.f32 %v2980_v56, %v2980_v56 }
 0x22a   : > { %v3109_v41 = vadd.f32 %v3108_v34, %v3078_v17  ;;  %3010 = vst [vmem:[%s5494_s22 + $0xc8] sm:$0xff] %v2978_v37  ;;  %v3041_v50 = vadd.f32 %v3040_v53, %v2978_v37  ;;  %v3079_v20 = vmul.f32 %v2978_v37, %v2978_v37  ;;  %v3828_v0 = vpop.f32.mrb[28].mxu1  ;;  %v3964_v22 = vpop.f32.mrb[28].mxu0 }
 0x22b   : > { %v3996_v30 = vadd.f32 %v3964_v22, %v3828_v0  ;;  %v2041_v57 = vpop.f32.mrb[29].mxu1  ;;  %v2899_v62 = vpop.f32.mrb[29].mxu0 }
 0x22c   : > { %v3042_v5 = vadd.f32 %v3041_v50, %v2979_v40  ;;  %v3110_v49 = vadd.f32 %v3109_v41, %v3079_v20  ;;  %v3997_v54 = vadd.f32 %v2899_v62, %v2041_v57  ;;  %v3829_v36 = vpop.f32.mrb[30].mxu1  ;;  %v3965_v45 = vpop.f32.mrb[30].mxu0 }
 0x22d   : > { %v2983_v19 = vadd.f32 %v3996_v30, %v5490_v16  ;;  %v3998_v52 = vadd.f32 %v3965_v45, %v3829_v36  ;;  %v2044_v3 = vpop.f32.mrb[31].mxu1  ;;  %v2902_v4 = vpop.f32.mrb[31].mxu0 }
 0x22e   : > { %v3111_v26 = vadd.f32 %v3110_v49, %v3080_v63  ;;  %v2981_v11 = vadd.f32 %v3997_v54, %v5490_v16  ;;  %v3043_v21 = vadd.f32 %v3042_v5, %v2980_v56  ;;  %v3999_v13 = vadd.f32 %v2902_v4, %v2044_v3 }
 0x22f   : > { %3015 = vst [vmem:[%s5494_s22 + $0xf0] sm:$0xff] %v2983_v19  ;;  %v2984_v24 = vadd.f32 %v3998_v52, %v5490_v16 }
 0x230   : > { %3013 = vst [vmem:[%s5494_s22 + $0xe0] sm:$0xff] %v2981_v11  ;;  %v3044_v29 = vadd.f32 %v3043_v21, %v2981_v11  ;;  %v3082_v9 = vmul.f32 %v2981_v11, %v2981_v11  ;;  %v3112_v10 = vadd.f32 %v3111_v26, %v3081_v31  ;;  %v2982_v51 = vadd.f32 %v3999_v13, %v5490_v16 }
 0x231   : > { %3016 = vst [vmem:[%s5494_s22 + $0xf8] sm:$0xff] %v2984_v24 }
 0x232   : > { %v3113_v33 = vadd.f32 %v3112_v10, %v3082_v9  ;;  %3014 = vst [vmem:[%s5494_s22 + $0xe8] sm:$0xff] %v2982_v51  ;;  %v3045_v39 = vadd.f32 %v3044_v29, %v2982_v51  ;;  %v3083_v58 = vmul.f32 %v2982_v51, %v2982_v51 }
 0x233   : > { %4332 = shalt.err (!%p4329_p5)
}
 0x234   : > { %s4333_s11 = scalar_lea.hbm %s5566_s5, 4096  ;;  %s4337_s21 = scalar_lea.hbm %s5654_s3, 8192 }
 0x235   : > { %p4334_p6 = scmp.ne.s32.totalorder %s5566_s5, %s4333_s11  ;;  %p4338_p10 = scmp.lt.u32.totalorder %s5566_s5, %s5654_s3 }
 0x236   : > { %p4339_p11 = scmp.lt.u32.totalorder %s4337_s21, %s4333_s11  ;;  %p4341_p13 = scmp.lt.u32.totalorder %s4333_s11, %s5566_s5 }
 0x237   : > { %p4335_p7 = pnand %p4334_p6, %p4500_p4 }
 0x238   : > { %p4340_p12 = por %p4339_p11, %p4338_p10 }
 0x239   : > { %p4336_p9 = pneg %p4335_p7 }
 0x23a   : > { %p4342_p0 = por %p4341_p13, %p4340_p12 }
 0x23c   : > { %p4343_p1 = pnand %p4342_p0, %p4336_p9 }
 0x23e   : > { %4346 = shalt.err (!%p4343_p1)
}
 0x23f   : > { %s4432_s29 = smov 128   ;;  %s4433_s30 = smov 8   ;;  %v3084_v16 = vmul.f32 %v2983_v19, %v2983_v19  ;;  %v3046_v42 = vadd.f32 %v3045_v39, %v2983_v19  ;;  %v3114_v15 = vadd.f32 %v3113_v33, %v3083_v58  ;;  %v3085_v27 = vmul.f32 %v2984_v24, %v2984_v24 }
 0x240   : > { %4235 = dma.vmem_to_hbm [thread:$0]  (%p4500_p4), %s5568_s26, 4096, %s5566_s5, %s3127_s6, %s4432_s29, %s4432_s29, %s4433_s30   ;;  %vm3123_vm8 = vcmask 1040384  }
 0x241   : > { %v3047_v6 = vadd.f32 %v3046_v42, %v2984_v24  ;;  %v3115_v44 = vadd.f32 %v3114_v15, %v3084_v16  ;;  %s3272_s7 = sshll.u32 %s5484_s12, 1  ;;  %s3503_s26 = sshll.u32 %s4421_s18, 5 }
 0x242   : > { %s217_s5 = scalar_lea.vmem [#allocation4], %s3272_s7  ;;  %s5603_s10 = scalar_lea.hbm %s5655_s4, %s3503_s26 }
 0x243   : > { %v3048_v7 = vrot.slane %v3047_v6, 4  ;;  %v3116_v60 = vadd.f32 %v3115_v44, %v3085_v27  ;;  %s3163_s6 = sshll.u32 %s217_s5, 4  ;;  %s3132_s11 = scalar_lea.sflag [#allocation5], %s5484_s12  ;;  %s5605_s6 = int_to_ptr.vmem [resolvable:$true] %s3163_s6 }
 0x244   : > { %s4347_s13 = scalar_lea.vmem %s5605_s6, 32  ;;  %s4434_s18 = smov [#allocation4]  }
 0x245   : > { %v3049_v8 = vadd.f32 %v3048_v7, %v3047_v6  ;;  %v3117_v14 = vrot.slane %v3116_v60, 4  ;;  %p4348_p2 = scmp.ne.s32.totalorder %s5605_s6, %s4347_s13  ;;  %s4351_s14 = sshll.u32 %s4434_s18, 4  ;;  %s4352_s14 = int_to_ptr.vmem [resolvable:$false] %s4351_s14 }
 0x246   : > { %s4353_s21 = scalar_lea.vmem %s4352_s14, 64  ;;  %p4354_p6 = scmp.lt.s32.totalorder %s5605_s6, %s4352_s14 }
 0x247   : > { %v3050_v28 = vrot.slane %v3049_v8, 2  ;;  %v3118_v25 = vadd.f32 %v3117_v14, %v3116_v60  ;;  %p4349_p3 = pnand %p4348_p2, %p4500_p4  ;;  %p4355_p7 = scmp.lt.s32.totalorder %s4353_s21, %s4347_s13 }
 0x249   : > { %v3051_v38 = vadd.f32 %v3050_v28, %v3049_v8  ;;  %v3119_v1 = vrot.slane %v3118_v25, 2  ;;  %p4350_p5 = pneg %p4349_p3  ;;  %p4356_p9 = por %p4355_p7, %p4354_p6 }
 0x24b   : > { %v3052_v46 = vrot.slane %v3051_v38, 1  ;;  %v3120_v47 = vadd.f32 %v3119_v1, %v3118_v25  ;;  %p4357_p10 = pnand %p4356_p9, %p4350_p5 }
 0x24d   : > { %v3121_v32 = vrot.slane %v3120_v47, 1  ;;  %v3053_v18 = vadd.f32 %v3052_v46, %v3051_v38 }
 0x24f   : > { %v3122_v43 = vadd.f32 %v3121_v32, %v3120_v47 }
 0x251   : > { %v3124_v55 = vsel %vm3123_vm8, %v3053_v18, %v3122_v43 }
 0x252   : > { %3125 = vst [vmem:[%s217_s5] sm:$0x3] %v3124_v55 }
 0x253   : > { %4360 = shalt.err (!%p4357_p10)
}
 0x254   : > { %s4361_s12 = scalar_lea.hbm %s5603_s10, 32  ;;  %s4365_s29 = scalar_lea.hbm %s5655_s4, 64 }
 0x255   : > { %p4362_p11 = scmp.ne.s32.totalorder %s5603_s10, %s4361_s12  ;;  %p4366_p0 = scmp.lt.u32.totalorder %s5603_s10, %s5655_s4 }
 0x256   : > { %p4367_p1 = scmp.lt.u32.totalorder %s4365_s29, %s4361_s12  ;;  %p4369_p3 = scmp.lt.u32.totalorder %s4361_s12, %s5603_s10 }
 0x257   : > { %p4363_p12 = pnand %p4362_p11, %p4500_p4 }
 0x258   : > { %p4368_p2 = por %p4367_p1, %p4366_p0 }
 0x259   : > { %p4364_p13 = pneg %p4363_p12 }
 0x25a   : > { %p4370_p5 = por %p4369_p3, %p4368_p2 }
 0x25c   : > { %p4371_p6 = pnand %p4370_p5, %p4364_p13 }
 0x25e   : > { %4374 = shalt.err (!%p4371_p6)
}
 0x25f   : > { %4236 = dma.vmem_to_hbm [thread:$0]  (%p4500_p4), %s5605_s6, 32, %s5603_s10, %s3132_s11  }
 0x260 PF: > { %p4246_p7 = scmp.ge.s32.totalorder %s4429_s20, 2  ;;  %s3175_s26 = sand.u32 1, %s4409_s15  }
 0x261   : > { %s3176_s5 = scalar_lea.sflag [#allocation3], %s3175_s26 }
 0x262   : > { %p4240_p9 = pnand %p4246_p7, %p4507_p8 }
 0x264   : > { %4400 = dma.done.wait (!%p4240_p9), %s3176_s5, 4096  }
 0x265   : > { %4402 = vsyncadd (!%p4240_p9), %s3176_s5, 4294963200  ;;  %s3185_s8 = scalar_lea.sflag [#allocation5], %s3175_s26 }
 0x266   : > { %4404 = dma.done.wait (!%p4240_p9), %s3185_s8, 32  }
 0x267   : > { %4406 = vsyncadd (!%p4240_p9), %s3185_s8, 4294967264  ;;  %s21_s20 = sadd.s32 1, %s4429_s20   ;;  %s5735_s15 = smov %s4413_s16 }
 0x268   : > { %p18_p10 = scmp.ge.s32.totalorder %s21_s20, 4   ;;  %s5736_s16 = smov %s4417_s17 }
 0x269   : > { %s5737_s17 = smov %s4513_s28  ;;  %s5738_s18 = smov %s4425_s19 }
 0x26a   : > { %s5739_s19 = smov %s5741_s23  ;;  %20 = sbr.rel (!%p18_p10) target bundleno = 6 (0x6), region = 93 }
 0x271   :  { %3190 = vsyncpa [#allocation3], 1 }
 0x272   :  { %3192 = vsyncpa [#allocation3 + $0x1], 1 }
 0x273   :  { %3193 = vsyncpa [#allocation5], 1 }
 0x274   :  { %3195 = vsyncpa [#allocation5 + $0x1], 1 }

</bundles_post_ra>
